<compile_context>
chip_gen: v7x
topology: tpu7x:2x2x1
jax: 0.10.0
libtpu: 0.0.40
codegen_flags: <defaults>
</compile_context>

<pallas_src>
import functools

import jax
import jax.numpy as jnp
from jax import lax
from jax.experimental import pallas as pl
from jax.experimental.pallas import tpu as pltpu


EPS = 1e-5
LANE = 128
VMEM_LIMIT = 32 * 1024 * 1024        # scoped VMEM limit (fits v5e/v6e/v7x)
TILE_VMEM_BUDGET = 20 * 1024 * 1024  # budget used when picking TILE_M


def _round_up(x, m):
    return (x + m - 1) // m * m


def _pick_tile_m(M, K, Cp, itemsize):
    """Largest row tile (multiple of 8, <=1024) whose working set fits VMEM."""
    def vmem_est(t):
        # double-buffered patch + output tiles, double-buffered weights,
        # plus the small (2, Cp) stats / gamma-beta blocks.
        return (2 * t * K * itemsize          # patch tile (in)
                + 2 * t * Cp * 4              # output tile (f32)
                + 2 * K * Cp * itemsize       # weights
                + 8 * Cp * 4)                 # sums / gamma-beta / scratch-ish
    tile = _round_up(min(1024, _round_up(M, 8)), 8)
    while tile > 8 and vmem_est(tile) > TILE_VMEM_BUDGET:
        tile = _round_up(tile // 2, 8)
    return tile


# ---------------------------------------------------------------------------
# Pass 1: conv tile (single im2col matmul) + global per-channel sum / sumsq.
# ---------------------------------------------------------------------------
def conv_stats_kernel(p_ref, w_ref, sums_ref):
    """p_ref:    (TILE_M, K)  im2col rows for this tile
       w_ref:    (K, Cp)      conv weights (Cout zero-padded to 128 lanes)
       sums_ref: (2, Cp)      accumulator; row 0 = sum, row 1 = sum of squares
    """
    @pl.when(pl.program_id(0) == 0)
    def _():
        sums_ref[...] = jnp.zeros_like(sums_ref)

    acc = jnp.dot(p_ref[...], w_ref[...], preferred_element_type=jnp.float32)
    sums_ref[0:1, :] += jnp.sum(acc, axis=0, keepdims=True)
    sums_ref[1:2, :] += jnp.sum(acc * acc, axis=0, keepdims=True)


# ---------------------------------------------------------------------------
# Pass 2: recompute conv tile, fold global stats into a fused BN affine
#         (scale/shift) in-kernel, apply + ReLU, lane-dense store.
# ---------------------------------------------------------------------------
def conv_bn_relu_kernel(p_ref, w_ref, sums_ref, gb_ref, o_ref, *, inv_count):
    """sums_ref: (2, Cp)  global sum / sum-of-squares (from pass 1)
       gb_ref:   (2, Cp)  row 0 = gamma, row 1 = beta (lane-padded)
       o_ref:    (TILE_M, Cp) lane-dense output tile
    """
    acc = jnp.dot(p_ref[...], w_ref[...], preferred_element_type=jnp.float32)
    mean = sums_ref[0:1, :] * inv_count
    var = jnp.maximum(sums_ref[1:2, :] * inv_count - mean * mean, 0.0)
    scale = gb_ref[0:1, :] * lax.rsqrt(var + EPS)       # EUP rsqrt, ~free slot
    shift = gb_ref[1:2, :] - mean * scale
    o_ref[...] = jnp.maximum(acc * scale + shift, 0.0)


# ---------------------------------------------------------------------------
# Wrapper: PyTorch-compatible NCHW in / NCHW out.
# ---------------------------------------------------------------------------
def block_forward(x_nchw, w_oihw, bias, gamma, beta, matmul_dtype=jnp.float32):
    N, Cin, H, W = x_nchw.shape
    Cout = w_oihw.shape[0]

    # Conv bias is exactly cancelled by the training-mode BatchNorm mean
    # subtraction, so it is intentionally not plumbed into the kernels.
    del bias

    M = N * H * W
    K = 9 * Cin
    Cp = _round_up(Cout, LANE)
    itemsize = jnp.dtype(matmul_dtype).itemsize

    tile_m = _pick_tile_m(M, K, Cp, itemsize)
    Mp = _round_up(M, tile_m)
    num_tiles = Mp // tile_m

    # ---- im2col in the wrapper: one [Mp, K] patch matrix (no lane padding) --
    x_nhwc = jnp.transpose(x_nchw, (0, 2, 3, 1)).astype(jnp.float32)
    x_pad = jnp.pad(x_nhwc, ((0, 0), (1, 1), (1, 1), (0, 0)))
    taps = [x_pad[:, dh:dh + H, dw:dw + W, :]
            for dh in range(3) for dw in range(3)]
    patches = jnp.concatenate(taps, axis=-1).reshape(M, K)          # (M, 9*Cin)
    patches = jnp.pad(patches, ((0, Mp - M), (0, 0)))               # (Mp, K)

    # (Cout, Cin, 3, 3) -> (3, 3, Cin, Cout) -> (9*Cin, Cout) -> (K, Cp)
    w_mat = jnp.transpose(w_oihw, (2, 3, 1, 0)).reshape(K, Cout).astype(jnp.float32)
    w_mat = jnp.pad(w_mat, ((0, 0), (0, Cp - Cout)))

    # Optional bf16 MXU operands (recommended on v6e); accumulation stays f32.
    patches = patches.astype(matmul_dtype)
    w_mat = w_mat.astype(matmul_dtype)

    gamma_p = jnp.pad(gamma.astype(jnp.float32), (0, Cp - Cout))
    beta_p = jnp.pad(beta.astype(jnp.float32), (0, Cp - Cout))
    gamma_beta = jnp.stack([gamma_p, beta_p], axis=0)               # (2, Cp)

    # Full-K blocks (allowed: full-dim blocks skip the 128-divisibility rule)
    # -> each patch tile is one contiguous HBM DMA.
    p_spec = pl.BlockSpec((tile_m, K), lambda i: (i, 0))
    w_spec = pl.BlockSpec((K, Cp), lambda i: (0, 0))
    vec2_spec = pl.BlockSpec((2, Cp), lambda i: (0, 0))

    flops_one_pass = 2 * Mp * K * Cp
    bytes_in = (patches.size + w_mat.size) * itemsize

    # ---- pass 1: conv + global per-channel sum / sum-of-squares ------------
    sums = pl.pallas_call(
        conv_stats_kernel,
        out_shape=jax.ShapeDtypeStruct((2, Cp), jnp.float32),
        grid_spec=pltpu.PrefetchScalarGridSpec(
            num_scalar_prefetch=0,
            grid=(num_tiles,),
            in_specs=[p_spec, w_spec],
            out_specs=pl.BlockSpec((2, Cp), lambda i: (0, 0))),
        compiler_params=pltpu.CompilerParams(
            dimension_semantics=("arbitrary",),   # accumulator across the axis
            vmem_limit_bytes=VMEM_LIMIT),
        cost_estimate=pl.CostEstimate(
            flops=flops_one_pass, transcendentals=0,
            bytes_accessed=bytes_in + 2 * Cp * 4),
    )(patches, w_mat)

    # ---- pass 2: recompute conv tile, fused BN affine + ReLU in-kernel -----
    kernel2 = functools.partial(conv_bn_relu_kernel, inv_count=1.0 / float(M))
    out_flat = pl.pallas_call(
        kernel2,
        out_shape=jax.ShapeDtypeStruct((Mp, Cp), jnp.float32),
        grid_spec=pltpu.PrefetchScalarGridSpec(
            num_scalar_prefetch=0,
            grid=(num_tiles,),
            in_specs=[p_spec, w_spec, vec2_spec, vec2_spec],
            out_specs=pl.BlockSpec((tile_m, Cp), lambda i: (i, 0))),
        compiler_params=pltpu.CompilerParams(
            dimension_semantics=("parallel",),     # independent tiles -> megacore
            vmem_limit_bytes=VMEM_LIMIT),
        cost_estimate=pl.CostEstimate(
            flops=flops_one_pass, transcendentals=Cp,
            bytes_accessed=bytes_in + 4 * Cp * 4 + Mp * Cp * 4),
    )(patches, w_mat, sums, gamma_beta)

    # Slice off channel / row padding, back to NCHW to match PyTorch.
    # (Keep NHWC end-to-end when the consumer accepts it to drop this transpose.)
    out = out_flat[:M, :Cout].reshape(N, H, W, Cout)
    return jnp.transpose(out, (0, 3, 1, 2))


# ---------------------------------------------------------------------------
# Pure-JAX reference (includes the conv bias, proving the BN cancellation).
# ---------------------------------------------------------------------------
def block_reference(x_nchw, w_oihw, bias, gamma, beta):
    N, Cin, H, W = x_nchw.shape
    Cout = w_oihw.shape[0]
    x_nhwc = jnp.transpose(x_nchw, (0, 2, 3, 1))
    x_pad = jnp.pad(x_nhwc, ((0, 0), (1, 1), (1, 1), (0, 0)))
    w_taps = jnp.transpose(w_oihw, (2, 3, 1, 0)).reshape(9, Cin, Cout)
    acc = jnp.zeros((N * H * W, Cout), jnp.float32)
    for tap in range(9):
        dh, dw = tap // 3, tap % 3
        patch = x_pad[:, dh:dh + H, dw:dw + W, :].reshape(N * H * W, Cin)
        acc = acc + patch @ w_taps[tap]
    acc = acc + bias[None, :]
    mean = jnp.mean(acc, axis=0, keepdims=True)
    var = jnp.mean((acc - mean) ** 2, axis=0, keepdims=True)
    y = (acc - mean) / jnp.sqrt(var + EPS) * gamma[None, :] + beta[None, :]
    y = jnp.maximum(y, 0.0).reshape(N, H, W, Cout)
    return jnp.transpose(y, (0, 3, 1, 2))


if __name__ == "__main__":
    # Block(inlen=4, outlen=8) on a batch of 2 images of spatial size 16x16.
    N, Cin, Cout, H, W = 2, 4, 8, 16, 16

    key = jax.random.PRNGKey(0)
    kx, kw, kb, kg, kbe = jax.random.split(key, 5)

    x = jax.random.normal(kx, (N, Cin, H, W), dtype=jnp.float32)
    w = jax.random.normal(kw, (Cout, Cin, 3, 3), dtype=jnp.float32) * 0.1
    b = jax.random.normal(kb, (Cout,), dtype=jnp.float32) * 0.1
    gamma = 1.0 + 0.1 * jax.random.normal(kg, (Cout,), dtype=jnp.float32)
    beta = 0.1 * jax.random.normal(kbe, (Cout,), dtype=jnp.float32)

    # Default f32 MXU operands (PyTorch parity).  On v6e, pass
    # matmul_dtype=jnp.bfloat16 for full-rate MXU and half the operand bytes.
    out = jax.jit(block_forward)(x, w, b, gamma, beta)
    out = jax.block_until_ready(out)

    ref = block_reference(x, w, b, gamma, beta)
    assert out.shape == (N, Cout, H, W)
    assert jnp.allclose(out, ref, atol=1e-3, rtol=1e-3), "mismatch vs reference"

    # TODO(synk): BatchNorm2d running_mean/running_var buffer updates (training-time
    # bookkeeping that does not affect the forward output) are not emitted.
    print("KERNEL_OK")
</pallas_src>

<mosaic_0001>
module attributes {stable_mosaic.version = 11 : i64} {
  func.func @conv_stats_kernel(%arg0: i32, %arg1: memref<512x36xf32, #tpu.memory_space<vmem>>, %arg2: memref<36x128xf32, #tpu.memory_space<vmem>>, %arg3: memref<2x128xf32, #tpu.memory_space<vmem>>) attributes {dimension_semantics = [#tpu.dimension_semantics<arbitrary>], iteration_bounds = array<i64: 1>, scalar_prefetch = 0 : i64, scratch_operands = 0 : i64, tpu.core_type = #tpu.core_type<tc>, window_params = [{transform_indices = @transform_0, window_bounds = array<i64: 512, 36>}, {pipeline_mode = #tpu.pipeline_mode<synchronous>, transform_indices = @transform_1, window_bounds = array<i64: 36, 128>}, {pipeline_mode = #tpu.pipeline_mode<synchronous>, transform_indices = @transform_2, window_bounds = array<i64: 2, 128>}]} {
    %c0_i32 = arith.constant 0 : i32
    %0 = arith.cmpi eq, %arg0, %c0_i32 : i32
    %1 = arith.extui %0 : i1 to i32
    %c0_i32_0 = arith.constant 0 : i32
    %2 = arith.cmpi ne, %1, %c0_i32_0 : i32
    scf.if %2 {
      %cst_13 = arith.constant 0.000000e+00 : f32
      %17 = vector.broadcast %cst_13 : f32 to vector<2x128xf32>
      %c0_14 = arith.constant 0 : index
      %c0_15 = arith.constant 0 : index
      %18 = vector.load %arg3[%c0_14, %c0_15] : memref<2x128xf32, #tpu.memory_space<vmem>>, vector<2x128xf32>
      tpu.vector_store %arg3[%c0_14, %c0_15], %17 {strides = array<i32>} : memref<2x128xf32, #tpu.memory_space<vmem>>, vector<2x128xf32>,
    } else {
    }
    %c0 = arith.constant 0 : index
    %c0_1 = arith.constant 0 : index
    %3 = vector.load %arg1[%c0, %c0_1] : memref<512x36xf32, #tpu.memory_space<vmem>>, vector<512x36xf32>
    %c0_2 = arith.constant 0 : index
    %c0_3 = arith.constant 0 : index
    %4 = vector.load %arg2[%c0_2, %c0_3] : memref<36x128xf32, #tpu.memory_space<vmem>>, vector<36x128xf32>
    %cst = arith.constant dense<0.000000e+00> : vector<512x128xf32>
    %5 = tpu.matmul %3, %4, %cst {dimension_numbers = #tpu.dot_dimension_numbers<[1], [0], [0], [1], [0, 0, 1, 1], [], []>} : vector<512x36xf32>, vector<36x128xf32>, vector<512x128xf32> -> vector<512x128xf32>
    %c0_4 = arith.constant 0 : index
    %c0_5 = arith.constant 0 : index
    %6 = vector.load %arg3[%c0_4, %c0_5] : memref<2x128xf32, #tpu.memory_space<vmem>>, vector<1x128xf32>
    %cst_6 = arith.constant dense<0.000000e+00> : vector<128xf32>
    %7 = vector.multi_reduction <add>, %5, %cst_6 [0] : vector<512x128xf32> to vector<128xf32>
    %8 = vector.shape_cast %7 : vector<128xf32> to vector<1x128xf32>
    %9 = arith.addf %6, %8 : vector<1x128xf32>
    %c0_7 = arith.constant 0 : index
    %c0_8 = arith.constant 0 : index
    %10 = vector.load %arg3[%c0_7, %c0_8] : memref<2x128xf32, #tpu.memory_space<vmem>>, vector<1x128xf32>
    tpu.vector_store %arg3[%c0_7, %c0_8], %9 {strides = array<i32>} : memref<2x128xf32, #tpu.memory_space<vmem>>, vector<1x128xf32>,
    %c1 = arith.constant 1 : index
    %c0_9 = arith.constant 0 : index
    %11 = vector.load %arg3[%c1, %c0_9] : memref<2x128xf32, #tpu.memory_space<vmem>>, vector<1x128xf32>
    %12 = arith.mulf %5, %5 : vector<512x128xf32>
    %cst_10 = arith.constant dense<0.000000e+00> : vector<128xf32>
    %13 = vector.multi_reduction <add>, %12, %cst_10 [0] : vector<512x128xf32> to vector<128xf32>
    %14 = vector.shape_cast %13 : vector<128xf32> to vector<1x128xf32>
    %15 = arith.addf %11, %14 : vector<1x128xf32>
    %c1_11 = arith.constant 1 : index
    %c0_12 = arith.constant 0 : index
    %16 = vector.load %arg3[%c1_11, %c0_12] : memref<2x128xf32, #tpu.memory_space<vmem>>, vector<1x128xf32>
    tpu.vector_store %arg3[%c1_11, %c0_12], %15 {strides = array<i32>} : memref<2x128xf32, #tpu.memory_space<vmem>>, vector<1x128xf32>,
    return
  }
  func.func @transform_0(%arg0: i32) -> (i32, i32) {
    %c0_i32 = arith.constant 0 : i32
    %c0_i32_0 = arith.constant 0 : i32
    return %arg0, %c0_i32 : i32, i32
  }
  func.func @transform_1(%arg0: i32) -> (i32, i32) {
    %c0_i32 = arith.constant 0 : i32
    %c0_i32_0 = arith.constant 0 : i32
    %c0_i32_1 = arith.constant 0 : i32
    return %c0_i32, %c0_i32_0 : i32, i32
  }
  func.func @transform_2(%arg0: i32) -> (i32, i32) {
    %c0_i32 = arith.constant 0 : i32
    %c0_i32_0 = arith.constant 0 : i32
    %c0_i32_1 = arith.constant 0 : i32
    return %c0_i32, %c0_i32_0 : i32, i32
  }
}

module attributes {stable_mosaic.version = 11 : i64} {
  func.func @conv_bn_relu_kernel(%arg0: i32, %arg1: memref<512x36xf32, #tpu.memory_space<vmem>>, %arg2: memref<36x128xf32, #tpu.memory_space<vmem>>, %arg3: memref<2x128xf32, #tpu.memory_space<vmem>>, %arg4: memref<2x128xf32, #tpu.memory_space<vmem>>, %arg5: memref<512x128xf32, #tpu.memory_space<vmem>>) attributes {dimension_semantics = [#tpu.dimension_semantics<parallel>], iteration_bounds = array<i64: 1>, scalar_prefetch = 0 : i64, scratch_operands = 0 : i64, tpu.core_type = #tpu.core_type<tc>, window_params = [{transform_indices = @transform_0, window_bounds = array<i64: 512, 36>}, {pipeline_mode = #tpu.pipeline_mode<synchronous>, transform_indices = @transform_1, window_bounds = array<i64: 36, 128>}, {pipeline_mode = #tpu.pipeline_mode<synchronous>, transform_indices = @transform_2, window_bounds = array<i64: 2, 128>}, {pipeline_mode = #tpu.pipeline_mode<synchronous>, transform_indices = @transform_3, window_bounds = array<i64: 2, 128>}, {transform_indices = @transform_4, window_bounds = array<i64: 512, 128>}]} {
    %c0 = arith.constant 0 : index
    %c0_0 = arith.constant 0 : index
    %0 = vector.load %arg1[%c0, %c0_0] : memref<512x36xf32, #tpu.memory_space<vmem>>, vector<512x36xf32>
    %c0_1 = arith.constant 0 : index
    %c0_2 = arith.constant 0 : index
    %1 = vector.load %arg2[%c0_1, %c0_2] : memref<36x128xf32, #tpu.memory_space<vmem>>, vector<36x128xf32>
    %cst = arith.constant dense<0.000000e+00> : vector<512x128xf32>
    %2 = tpu.matmul %0, %1, %cst {dimension_numbers = #tpu.dot_dimension_numbers<[1], [0], [0], [1], [0, 0, 1, 1], [], []>} : vector<512x36xf32>, vector<36x128xf32>, vector<512x128xf32> -> vector<512x128xf32>
    %c0_3 = arith.constant 0 : index
    %c0_4 = arith.constant 0 : index
    %3 = vector.load %arg3[%c0_3, %c0_4] : memref<2x128xf32, #tpu.memory_space<vmem>>, vector<1x128xf32>
    %cst_5 = arith.constant 0.001953125 : f32
    %4 = vector.broadcast %cst_5 : f32 to vector<1x128xf32>
    %5 = arith.mulf %3, %4 : vector<1x128xf32>
    %c1 = arith.constant 1 : index
    %c0_6 = arith.constant 0 : index
    %6 = vector.load %arg3[%c1, %c0_6] : memref<2x128xf32, #tpu.memory_space<vmem>>, vector<1x128xf32>
    %cst_7 = arith.constant 0.001953125 : f32
    %7 = vector.broadcast %cst_7 : f32 to vector<1x128xf32>
    %8 = arith.mulf %6, %7 : vector<1x128xf32>
    %9 = arith.mulf %5, %5 : vector<1x128xf32>
    %10 = arith.subf %8, %9 : vector<1x128xf32>
    %cst_8 = arith.constant 0.000000e+00 : f32
    %11 = vector.broadcast %cst_8 : f32 to vector<1x128xf32>
    %12 = arith.maximumf %10, %11 : vector<1x128xf32>
    %c0_9 = arith.constant 0 : index
    %c0_10 = arith.constant 0 : index
    %13 = vector.load %arg4[%c0_9, %c0_10] : memref<2x128xf32, #tpu.memory_space<vmem>>, vector<1x128xf32>
    %cst_11 = arith.constant 9.99999974E-6 : f32
    %14 = vector.broadcast %cst_11 : f32 to vector<1x128xf32>
    %15 = arith.addf %12, %14 : vector<1x128xf32>
    %16 = math.rsqrt %15 : vector<1x128xf32>
    %17 = arith.mulf %13, %16 : vector<1x128xf32>
    %c1_12 = arith.constant 1 : index
    %c0_13 = arith.constant 0 : index
    %18 = vector.load %arg4[%c1_12, %c0_13] : memref<2x128xf32, #tpu.memory_space<vmem>>, vector<1x128xf32>
    %19 = arith.mulf %5, %17 : vector<1x128xf32>
    %20 = arith.subf %18, %19 : vector<1x128xf32>
    %21 = vector.broadcast %17 : vector<1x128xf32> to vector<512x128xf32>
    %22 = arith.mulf %2, %21 : vector<512x128xf32>
    %23 = vector.broadcast %20 : vector<1x128xf32> to vector<512x128xf32>
    %24 = arith.addf %22, %23 : vector<512x128xf32>
    %cst_14 = arith.constant 0.000000e+00 : f32
    %25 = vector.broadcast %cst_14 : f32 to vector<512x128xf32>
    %26 = arith.maximumf %24, %25 : vector<512x128xf32>
    %c0_15 = arith.constant 0 : index
    %c0_16 = arith.constant 0 : index
    %27 = vector.load %arg5[%c0_15, %c0_16] : memref<512x128xf32, #tpu.memory_space<vmem>>, vector<512x128xf32>
    tpu.vector_store %arg5[%c0_15, %c0_16], %26 {strides = array<i32>} : memref<512x128xf32, #tpu.memory_space<vmem>>, vector<512x128xf32>,
    return
  }
  func.func @transform_0(%arg0: i32) -> (i32, i32) {
    %c0_i32 = arith.constant 0 : i32
    %c0_i32_0 = arith.constant 0 : i32
    return %arg0, %c0_i32 : i32, i32
  }
  func.func @transform_1(%arg0: i32) -> (i32, i32) {
    %c0_i32 = arith.constant 0 : i32
    %c0_i32_0 = arith.constant 0 : i32
    %c0_i32_1 = arith.constant 0 : i32
    return %c0_i32, %c0_i32_0 : i32, i32
  }
  func.func @transform_2(%arg0: i32) -> (i32, i32) {
    %c0_i32 = arith.constant 0 : i32
    %c0_i32_0 = arith.constant 0 : i32
    %c0_i32_1 = arith.constant 0 : i32
    return %c0_i32, %c0_i32_0 : i32, i32
  }
  func.func @transform_3(%arg0: i32) -> (i32, i32) {
    %c0_i32 = arith.constant 0 : i32
    %c0_i32_0 = arith.constant 0 : i32
    %c0_i32_1 = arith.constant 0 : i32
    return %c0_i32, %c0_i32_0 : i32, i32
  }
  func.func @transform_4(%arg0: i32) -> (i32, i32) {
    %c0_i32 = arith.constant 0 : i32
    %c0_i32_0 = arith.constant 0 : i32
    return %arg0, %c0_i32 : i32, i32
  }
}

</mosaic_0001>

<bundles_post_ra>
// kernel: block_forward.2
= control target key start
LH: loop header
LB: loop body
LE: loop exit
PB: predicated region body
PF: predicated region fallthrough
CT: control target
= control target key end

     0   :  { %vm85_vm0 = vcmask 293888   ;;  %vm278_vm1 = vcmask 1043456   ;;  %s1596_s1 = inlined_call_operand.vmem [shape: f32[36,128], index: 1, kind: input, shape index: {}]   ;;  %s1597_s0 = inlined_call_operand.vmem [shape: f32[512,36], index: 0, kind: input, shape index: {}]   ;;  %s1598_s2 = inlined_call_operand.vmem [shape: f32[2,128], index: 2, kind: output, shape index: {}]  }
   0x1   :  { %v80_v0 = vld [vmem:[%s1596_s1] sm:$0xff]  ;;  %v81_v1 = vld [vmem:[%s1596_s1 + $0x8] sm:$0xff]  ;;  %v82_v2 = vld [vmem:[%s1596_s1 + $0x10] sm:$0xff] }
   0x2   :  { %v1119_v3 = vpack.c.bf16 %v81_v1, %v80_v0  ;;  %v83_v4 = vld [vmem:[%s1596_s1 + $0x18] sm:$0xff]  ;;  %v16_v5 = vld [vmem:[%s1597_s0] sm:$0xff]  ;;  %v17_v8 = vld [vmem:[%s1597_s0 + $0x8] sm:$0xff] }
   0x3   :  { %v1123_v6 = vpack.c.bf16 %v83_v4, %v82_v2  ;;  %1023 = vmatprep.mubr.msk.f32.mxu0 %vm85_vm0, %v16_v5  ;;  %v84_v7 = vld [vmem:[%s1596_s1 + $0x20] sm:$0xf]  ;;  %v18_v9 = vld [vmem:[%s1597_s0 + $0x10] sm:$0xff]  ;;  %v49_v11 = vld [vmem:[%s1597_s0 + $0x108] sm:$0xff] }
   0x4   :  { %1120 = vmatprep.subr.bf16.mxu0 %v1119_v3  ;;  %1127 = vmatprep.subr.bf16.mxu1 %v1119_v3  ;;  %v48_v10 = vld [vmem:[%s1597_s0 + $0x100] sm:$0xff]  ;;  %v50_v12 = vld [vmem:[%s1597_s0 + $0x110] sm:$0xff]  ;;  %v19_v13 = vld [vmem:[%s1597_s0 + $0x18] sm:$0xff] }
   0x5   :  { %1122 = vmatpush3.bf16.msra.mxu0 %v1119_v3  ;;  %1130 = vmatpush3.bf16.msra.mxu1 %v1119_v3  ;;  %v20_v14 = vld [vmem:[%s1597_s0 + $0x20] sm:$0xff]  ;;  %v51_v15 = vld [vmem:[%s1597_s0 + $0x118] sm:$0xff]  ;;  %v21_v17 = vld [vmem:[%s1597_s0 + $0x28] sm:$0xff] }
   0x6   :  { %1124 = vmatprep.subr.bf16.mxu0 %v1123_v6  ;;  %1128 = vmatprep.subr.bf16.mxu1 %v1123_v6  ;;  %v52_v16 = vld [vmem:[%s1597_s0 + $0x120] sm:$0xff]  ;;  %v22_v18 = vld [vmem:[%s1597_s0 + $0x30] sm:$0xff]  ;;  %v53_v19 = vld [vmem:[%s1597_s0 + $0x128] sm:$0xff] }
   0x7   :  { %1071 = vmatprep.mubr.msk.f32.mxu1 %vm85_vm0, %v48_v10  ;;  %v54_v20 = vld [vmem:[%s1597_s0 + $0x130] sm:$0xff]  ;;  %v23_v21 = vld [vmem:[%s1597_s0 + $0x38] sm:$0xff]  ;;  %v24_v22 = vld [vmem:[%s1597_s0 + $0x40] sm:$0xff] }
   0x8   :  { %v55_v23 = vld [vmem:[%s1597_s0 + $0x138] sm:$0xff]  ;;  %v56_v24 = vld [vmem:[%s1597_s0 + $0x140] sm:$0xff]  ;;  %v25_v25 = vld [vmem:[%s1597_s0 + $0x48] sm:$0xff] }
   0x9   :  { %1126 = vmatpush3.bf16.msra.mxu0 %v1123_v6  ;;  %1131 = vmatpush3.bf16.msra.mxu1 %v1123_v6  ;;  %v26_v26 = vld [vmem:[%s1597_s0 + $0x50] sm:$0xff]  ;;  %v57_v27 = vld [vmem:[%s1597_s0 + $0x148] sm:$0xff]  ;;  %v27_v29 = vld [vmem:[%s1597_s0 + $0x58] sm:$0xff] }
   0xa   :  { %1021 = vmatprep.subr.msk.mxu0 %vm278_vm1, %v84_v7  ;;  %1129 = vmatprep.subr.msk.mxu1 %vm278_vm1, %v84_v7  ;;  %v58_v28 = vld [vmem:[%s1597_s0 + $0x150] sm:$0xff]  ;;  %v28_v30 = vld [vmem:[%s1597_s0 + $0x60] sm:$0xff]  ;;  %v59_v31 = vld [vmem:[%s1597_s0 + $0x158] sm:$0xff] }
   0xb   :  { %v60_v32 = vld [vmem:[%s1597_s0 + $0x160] sm:$0xff]  ;;  %v29_v33 = vld [vmem:[%s1597_s0 + $0x68] sm:$0xff]  ;;  %v30_v34 = vld [vmem:[%s1597_s0 + $0x70] sm:$0xff] }
   0xc   :  { %v61_v35 = vld [vmem:[%s1597_s0 + $0x168] sm:$0xff]  ;;  %v62_v36 = vld [vmem:[%s1597_s0 + $0x170] sm:$0xff]  ;;  %v31_v37 = vld [vmem:[%s1597_s0 + $0x78] sm:$0xff] }
   0xd   :  { %1022 = vmatpush3.msk.msra.mxu0 %vm278_vm1, %v84_v7  ;;  %1132 = vmatpush3.msk.msra.mxu1 %vm278_vm1, %v84_v7  ;;  %v32_v38 = vld [vmem:[%s1597_s0 + $0x80] sm:$0xff]  ;;  %v63_v39 = vld [vmem:[%s1597_s0 + $0x178] sm:$0xff]  ;;  %v33_v41 = vld [vmem:[%s1597_s0 + $0x88] sm:$0xff]  ;;  %v1134_v7 = vmov 0.0  }
   0xe   :  { %1024 = vmatmul.mubr.msk.f32.vlgmr.msra.gmra.mrb[0].mxu0 %vm85_vm0, %v17_v8  ;;  %1072 = vmatmul.mubr.msk.f32.vlgmr.msra.gmra.mrb[0].mxu1 %vm85_vm0, %v49_v11  ;;  %v64_v40 = vld [vmem:[%s1597_s0 + $0x180] sm:$0xff]  ;;  %v34_v42 = vld [vmem:[%s1597_s0 + $0x90] sm:$0xff]  ;;  %v65_v43 = vld [vmem:[%s1597_s0 + $0x188] sm:$0xff]  ;;  %15 = vst [vmem:[%s1598_s2] sm:$0x3] %v1134_v7 }
   0xf   :  { %1026 = vmatprep.mubr.msk.f32.mxu0 %vm85_vm0, %v18_v9  ;;  %1074 = vmatprep.mubr.msk.f32.mxu1 %vm85_vm0, %v50_v12  ;;  %v66_v44 = vld [vmem:[%s1597_s0 + $0x190] sm:$0xff]  ;;  %v35_v45 = vld [vmem:[%s1597_s0 + $0x98] sm:$0xff]  ;;  %v36_v46 = vld [vmem:[%s1597_s0 + $0xa0] sm:$0xff] }
  0x10   :  { %v67_v47 = vld [vmem:[%s1597_s0 + $0x198] sm:$0xff]  ;;  %v68_v48 = vld [vmem:[%s1597_s0 + $0x1a0] sm:$0xff]  ;;  %v37_v49 = vld [vmem:[%s1597_s0 + $0xa8] sm:$0xff] }
  0x11   :  { %v38_v50 = vld [vmem:[%s1597_s0 + $0xb0] sm:$0xff]  ;;  %v69_v51 = vld [vmem:[%s1597_s0 + $0x1a8] sm:$0xff]  ;;  %v39_v53 = vld [vmem:[%s1597_s0 + $0xb8] sm:$0xff] }
  0x12   :  { %1027 = vmatmul.mubr.msk.f32.gmra.mrb[2].mxu0 %vm85_vm0, %v19_v13  ;;  %1075 = vmatmul.mubr.msk.f32.gmra.mrb[2].mxu1 %vm85_vm0, %v51_v15  ;;  %v70_v52 = vld [vmem:[%s1597_s0 + $0x1b0] sm:$0xff]  ;;  %v40_v54 = vld [vmem:[%s1597_s0 + $0xc0] sm:$0xff]  ;;  %v71_v55 = vld [vmem:[%s1597_s0 + $0x1b8] sm:$0xff] }
  0x13   :  { %1029 = vmatprep.mubr.msk.f32.mxu0 %vm85_vm0, %v20_v14  ;;  %1077 = vmatprep.mubr.msk.f32.mxu1 %vm85_vm0, %v52_v16  ;;  %v72_v56 = vld [vmem:[%s1597_s0 + $0x1c0] sm:$0xff]  ;;  %v41_v57 = vld [vmem:[%s1597_s0 + $0xc8] sm:$0xff]  ;;  %v42_v58 = vld [vmem:[%s1597_s0 + $0xd0] sm:$0xff] }
  0x14   :  { %v73_v59 = vld [vmem:[%s1597_s0 + $0x1c8] sm:$0xff]  ;;  %v74_v60 = vld [vmem:[%s1597_s0 + $0x1d0] sm:$0xff]  ;;  %v43_v61 = vld [vmem:[%s1597_s0 + $0xd8] sm:$0xff] }
  0x15   :  { %v44_v62 = vld [vmem:[%s1597_s0 + $0xe0] sm:$0xff]  ;;  %v75_v63 = vld [vmem:[%s1597_s0 + $0x1d8] sm:$0xff]  ;;  %v45_v1 = vld [vmem:[%s1597_s0 + $0xe8] sm:$0xff] }
  0x16   :  { %1030 = vmatmul.mubr.msk.f32.gmra.mrb[4].mxu0 %vm85_vm0, %v21_v17  ;;  %1078 = vmatmul.mubr.msk.f32.gmra.mrb[4].mxu1 %vm85_vm0, %v53_v19  ;;  %v76_v0 = vld [vmem:[%s1597_s0 + $0x1e0] sm:$0xff]  ;;  %v46_v2 = vld [vmem:[%s1597_s0 + $0xf0] sm:$0xff]  ;;  %v77_v3 = vld [vmem:[%s1597_s0 + $0x1e8] sm:$0xff] }
  0x17   :  { %1032 = vmatprep.mubr.msk.f32.mxu0 %vm85_vm0, %v22_v18  ;;  %1080 = vmatprep.mubr.msk.f32.mxu1 %vm85_vm0, %v54_v20  ;;  %v78_v4 = vld [vmem:[%s1597_s0 + $0x1f0] sm:$0xff]  ;;  %v47_v5 = vld [vmem:[%s1597_s0 + $0xf8] sm:$0xff] }
  0x18   :  { %v79_v6 = vld [vmem:[%s1597_s0 + $0x1f8] sm:$0xff] }
  0x1a   :  { %1033 = vmatmul.mubr.msk.f32.gmra.mrb[6].mxu0 %vm85_vm0, %v23_v21  ;;  %1081 = vmatmul.mubr.msk.f32.gmra.mrb[6].mxu1 %vm85_vm0, %v55_v23 }
  0x1b   :  { %1035 = vmatprep.mubr.msk.f32.mxu0 %vm85_vm0, %v24_v22  ;;  %1083 = vmatprep.mubr.msk.f32.mxu1 %vm85_vm0, %v56_v24 }
  0x1e   :  { %1036 = vmatmul.mubr.msk.f32.gmra.mrb[8].mxu0 %vm85_vm0, %v25_v25  ;;  %1084 = vmatmul.mubr.msk.f32.gmra.mrb[8].mxu1 %vm85_vm0, %v57_v27 }
  0x1f   :  { %1038 = vmatprep.mubr.msk.f32.mxu0 %vm85_vm0, %v26_v26  ;;  %1086 = vmatprep.mubr.msk.f32.mxu1 %vm85_vm0, %v58_v28 }
  0x22   :  { %1039 = vmatmul.mubr.msk.f32.gmra.mrb[10].mxu0 %vm85_vm0, %v27_v29  ;;  %1087 = vmatmul.mubr.msk.f32.gmra.mrb[10].mxu1 %vm85_vm0, %v59_v31 }
  0x23   :  { %1041 = vmatprep.mubr.msk.f32.mxu0 %vm85_vm0, %v28_v30  ;;  %1089 = vmatprep.mubr.msk.f32.mxu1 %vm85_vm0, %v60_v32 }
  0x26   :  { %1042 = vmatmul.mubr.msk.f32.gmra.mrb[12].mxu0 %vm85_vm0, %v29_v33  ;;  %1090 = vmatmul.mubr.msk.f32.gmra.mrb[12].mxu1 %vm85_vm0, %v61_v35 }
  0x27   :  { %1044 = vmatprep.mubr.msk.f32.mxu0 %vm85_vm0, %v30_v34  ;;  %1092 = vmatprep.mubr.msk.f32.mxu1 %vm85_vm0, %v62_v36 }
  0x2a   :  { %1045 = vmatmul.mubr.msk.f32.gmra.mrb[14].mxu0 %vm85_vm0, %v31_v37  ;;  %1093 = vmatmul.mubr.msk.f32.gmra.mrb[14].mxu1 %vm85_vm0, %v63_v39 }
  0x2b   :  { %1047 = vmatprep.mubr.msk.f32.mxu0 %vm85_vm0, %v32_v38  ;;  %1095 = vmatprep.mubr.msk.f32.mxu1 %vm85_vm0, %v64_v40 }
  0x2e   :  { %1048 = vmatmul.mubr.msk.f32.gmra.mrb[16].mxu0 %vm85_vm0, %v33_v41  ;;  %1096 = vmatmul.mubr.msk.f32.gmra.mrb[16].mxu1 %vm85_vm0, %v65_v43 }
  0x2f   :  { %1050 = vmatprep.mubr.msk.f32.mxu0 %vm85_vm0, %v34_v42  ;;  %1098 = vmatprep.mubr.msk.f32.mxu1 %vm85_vm0, %v66_v44 }
  0x32   :  { %1051 = vmatmul.mubr.msk.f32.gmra.mrb[18].mxu0 %vm85_vm0, %v35_v45  ;;  %1099 = vmatmul.mubr.msk.f32.gmra.mrb[18].mxu1 %vm85_vm0, %v67_v47 }
  0x33   :  { %1053 = vmatprep.mubr.msk.f32.mxu0 %vm85_vm0, %v36_v46  ;;  %1101 = vmatprep.mubr.msk.f32.mxu1 %vm85_vm0, %v68_v48 }
  0x36   :  { %1054 = vmatmul.mubr.msk.f32.gmra.mrb[20].mxu0 %vm85_vm0, %v37_v49  ;;  %1102 = vmatmul.mubr.msk.f32.gmra.mrb[20].mxu1 %vm85_vm0, %v69_v51 }
  0x37   :  { %1056 = vmatprep.mubr.msk.f32.mxu0 %vm85_vm0, %v38_v50  ;;  %1104 = vmatprep.mubr.msk.f32.mxu1 %vm85_vm0, %v70_v52 }
  0x3a   :  { %1057 = vmatmul.mubr.msk.f32.gmra.mrb[22].mxu0 %vm85_vm0, %v39_v53  ;;  %1105 = vmatmul.mubr.msk.f32.gmra.mrb[22].mxu1 %vm85_vm0, %v71_v55 }
  0x3b   :  { %1059 = vmatprep.mubr.msk.f32.mxu0 %vm85_vm0, %v40_v54  ;;  %1107 = vmatprep.mubr.msk.f32.mxu1 %vm85_vm0, %v72_v56 }
  0x3e   :  { %1060 = vmatmul.mubr.msk.f32.gmra.mrb[24].mxu0 %vm85_vm0, %v41_v57  ;;  %1108 = vmatmul.mubr.msk.f32.gmra.mrb[24].mxu1 %vm85_vm0, %v73_v59 }
  0x3f   :  { %1062 = vmatprep.mubr.msk.f32.mxu0 %vm85_vm0, %v42_v58  ;;  %1110 = vmatprep.mubr.msk.f32.mxu1 %vm85_vm0, %v74_v60 }
  0x42   :  { %1063 = vmatmul.mubr.msk.f32.gmra.mrb[26].mxu0 %vm85_vm0, %v43_v61  ;;  %1111 = vmatmul.mubr.msk.f32.gmra.mrb[26].mxu1 %vm85_vm0, %v75_v63 }
  0x43   :  { %1065 = vmatprep.mubr.msk.f32.mxu0 %vm85_vm0, %v44_v62  ;;  %1113 = vmatprep.mubr.msk.f32.mxu1 %vm85_vm0, %v76_v0 }
  0x46   :  { %1066 = vmatmul.mubr.msk.f32.gmra.mrb[28].mxu0 %vm85_vm0, %v45_v1  ;;  %1114 = vmatmul.mubr.msk.f32.gmra.mrb[28].mxu1 %vm85_vm0, %v77_v3 }
  0x47   :  { %1068 = vmatprep.mubr.msk.f32.mxu0 %vm85_vm0, %v46_v2  ;;  %1116 = vmatprep.mubr.msk.f32.mxu1 %vm85_vm0, %v78_v4 }
  0x4a   :  { %1069 = vmatmul.mubr.msk.f32.gmra.mrb[30].mxu0 %vm85_vm0, %v47_v5  ;;  %1117 = vmatmul.mubr.msk.f32.gmra.mrb[30].mxu1 %vm85_vm0, %v79_v6 }
  0xe1   :  { %v1025_v8 = vpop.f32.mrb[0].mxu0  ;;  %v1424_v11 = vpop.f32.mrb[0].mxu1 }
  0xe2   :  { %v741_v9 = vmul.f32 %v1025_v8, %v1025_v8  ;;  %v348_v10 = vpop.f32.mrb[1].mxu0  ;;  %v1426_v14 = vpop.f32.mrb[1].mxu1 }
  0xe3   :  { %v668_v12 = vadd.f32 %v1025_v8, %v348_v10  ;;  %v740_v13 = vmul.f32 %v348_v10, %v348_v10 }
  0xe5   :  { %v804_v15 = vadd.f32 %v741_v9, %v740_v13  ;;  %v1028_v16 = vpop.f32.mrb[2].mxu0  ;;  %v1428_v18 = vpop.f32.mrb[2].mxu1 }
  0xe6   :  { %v358_v17 = vpop.f32.mrb[3].mxu0  ;;  %v1430_v21 = vpop.f32.mrb[3].mxu1  ;;  %v743_v22 = vmul.f32 %v1028_v16, %v1028_v16 }
  0xe7   :  { %v669_v19 = vadd.f32 %v668_v12, %v358_v17  ;;  %v742_v20 = vmul.f32 %v358_v17, %v358_v17 }
  0xe9   :  { %v805_v23 = vadd.f32 %v804_v15, %v742_v20  ;;  %v1031_v24 = vpop.f32.mrb[4].mxu0  ;;  %v670_v25 = vadd.f32 %v1028_v16, %v669_v19  ;;  %v1432_v27 = vpop.f32.mrb[4].mxu1 }
  0xea   :  { %v368_v26 = vpop.f32.mrb[5].mxu0  ;;  %v1434_v31 = vpop.f32.mrb[5].mxu1  ;;  %v745_v32 = vmul.f32 %v1031_v24, %v1031_v24 }
  0xeb   :  { %v671_v28 = vadd.f32 %v670_v25, %v368_v26  ;;  %v744_v29 = vmul.f32 %v368_v26, %v368_v26  ;;  %v806_v30 = vadd.f32 %v805_v23, %v743_v22 }
  0xed   :  { %v807_v33 = vadd.f32 %v806_v30, %v744_v29  ;;  %v1034_v34 = vpop.f32.mrb[6].mxu0  ;;  %v672_v35 = vadd.f32 %v1031_v24, %v671_v28  ;;  %v1436_v37 = vpop.f32.mrb[6].mxu1 }
  0xee   :  { %v378_v36 = vpop.f32.mrb[7].mxu0  ;;  %v1438_v41 = vpop.f32.mrb[7].mxu1  ;;  %v747_v42 = vmul.f32 %v1034_v34, %v1034_v34 }
  0xef   :  { %v673_v38 = vadd.f32 %v672_v35, %v378_v36  ;;  %v746_v39 = vmul.f32 %v378_v36, %v378_v36  ;;  %v808_v40 = vadd.f32 %v807_v33, %v745_v32 }
  0xf1   :  { %v809_v43 = vadd.f32 %v808_v40, %v746_v39  ;;  %v1037_v44 = vpop.f32.mrb[8].mxu0  ;;  %v674_v45 = vadd.f32 %v1034_v34, %v673_v38  ;;  %v1440_v47 = vpop.f32.mrb[8].mxu1 }
  0xf2   :  { %v388_v46 = vpop.f32.mrb[9].mxu0  ;;  %v1442_v51 = vpop.f32.mrb[9].mxu1  ;;  %v749_v52 = vmul.f32 %v1037_v44, %v1037_v44 }
  0xf3   :  { %v675_v48 = vadd.f32 %v674_v45, %v388_v46  ;;  %v748_v49 = vmul.f32 %v388_v46, %v388_v46  ;;  %v810_v50 = vadd.f32 %v809_v43, %v747_v42 }
  0xf5   :  { %v811_v53 = vadd.f32 %v810_v50, %v748_v49  ;;  %v1040_v54 = vpop.f32.mrb[10].mxu0  ;;  %v676_v55 = vadd.f32 %v1037_v44, %v675_v48  ;;  %v1444_v57 = vpop.f32.mrb[10].mxu1 }
  0xf6   :  { %v398_v56 = vpop.f32.mrb[11].mxu0  ;;  %v1446_v61 = vpop.f32.mrb[11].mxu1  ;;  %v751_v62 = vmul.f32 %v1040_v54, %v1040_v54 }
  0xf7   :  { %v677_v58 = vadd.f32 %v676_v55, %v398_v56  ;;  %v750_v59 = vmul.f32 %v398_v56, %v398_v56  ;;  %v812_v60 = vadd.f32 %v811_v53, %v749_v52 }
  0xf9   :  { %v813_v63 = vadd.f32 %v812_v60, %v750_v59  ;;  %v1043_v0 = vpop.f32.mrb[12].mxu0  ;;  %v678_v1 = vadd.f32 %v1040_v54, %v677_v58  ;;  %v1448_v3 = vpop.f32.mrb[12].mxu1 }
  0xfa   :  { %v408_v2 = vpop.f32.mrb[13].mxu0  ;;  %v1450_v7 = vpop.f32.mrb[13].mxu1  ;;  %v753_v8 = vmul.f32 %v1043_v0, %v1043_v0 }
  0xfb   :  { %v679_v4 = vadd.f32 %v678_v1, %v408_v2  ;;  %v752_v5 = vmul.f32 %v408_v2, %v408_v2  ;;  %v814_v6 = vadd.f32 %v813_v63, %v751_v62 }
  0xfd   :  { %v815_v9 = vadd.f32 %v814_v6, %v752_v5  ;;  %v1046_v10 = vpop.f32.mrb[14].mxu0  ;;  %v680_v12 = vadd.f32 %v1043_v0, %v679_v4  ;;  %v1452_v15 = vpop.f32.mrb[14].mxu1 }
  0xfe   :  { %v418_v13 = vpop.f32.mrb[15].mxu0  ;;  %v1454_v20 = vpop.f32.mrb[15].mxu1  ;;  %v755_v22 = vmul.f32 %v1046_v10, %v1046_v10 }
  0xff   :  { %v681_v16 = vadd.f32 %v680_v12, %v418_v13  ;;  %v754_v17 = vmul.f32 %v418_v13, %v418_v13  ;;  %v816_v19 = vadd.f32 %v815_v9, %v753_v8 }
 0x101   :  { %v817_v23 = vadd.f32 %v816_v19, %v754_v17  ;;  %v1049_v24 = vpop.f32.mrb[16].mxu0  ;;  %v682_v25 = vadd.f32 %v1046_v10, %v681_v16  ;;  %v1456_v28 = vpop.f32.mrb[16].mxu1 }
 0x102   :  { %v428_v26 = vpop.f32.mrb[17].mxu0  ;;  %v1458_v33 = vpop.f32.mrb[17].mxu1  ;;  %v757_v34 = vmul.f32 %v1049_v24, %v1049_v24 }
 0x103   :  { %v683_v29 = vadd.f32 %v682_v25, %v428_v26  ;;  %v756_v30 = vmul.f32 %v428_v26, %v428_v26  ;;  %v818_v32 = vadd.f32 %v817_v23, %v755_v22 }
 0x105   :  { %v819_v35 = vadd.f32 %v818_v32, %v756_v30  ;;  %v1052_v36 = vpop.f32.mrb[18].mxu0  ;;  %v684_v38 = vadd.f32 %v1049_v24, %v683_v29  ;;  %v1460_v40 = vpop.f32.mrb[18].mxu1 }
 0x106   :  { %v438_v39 = vpop.f32.mrb[19].mxu0  ;;  %v1462_v45 = vpop.f32.mrb[19].mxu1  ;;  %v759_v46 = vmul.f32 %v1052_v36, %v1052_v36 }
 0x107   :  { %v685_v42 = vadd.f32 %v684_v38, %v438_v39  ;;  %v758_v43 = vmul.f32 %v438_v39, %v438_v39  ;;  %v820_v44 = vadd.f32 %v819_v35, %v757_v34 }
 0x109   :  { %v821_v48 = vadd.f32 %v820_v44, %v758_v43  ;;  %v1055_v49 = vpop.f32.mrb[20].mxu0  ;;  %v686_v50 = vadd.f32 %v1052_v36, %v685_v42  ;;  %v1464_v53 = vpop.f32.mrb[20].mxu1 }
 0x10a   :  { %v448_v52 = vpop.f32.mrb[21].mxu0  ;;  %v1466_v58 = vpop.f32.mrb[21].mxu1  ;;  %v761_v59 = vmul.f32 %v1055_v49, %v1055_v49 }
 0x10b   :  { %v687_v54 = vadd.f32 %v686_v50, %v448_v52  ;;  %v760_v55 = vmul.f32 %v448_v52, %v448_v52  ;;  %v822_v56 = vadd.f32 %v821_v48, %v759_v46 }
 0x10d   :  { %v823_v60 = vadd.f32 %v822_v56, %v760_v55  ;;  %v1058_v62 = vpop.f32.mrb[22].mxu0  ;;  %v688_v63 = vadd.f32 %v1055_v49, %v687_v54  ;;  %v1468_v1 = vpop.f32.mrb[22].mxu1 }
 0x10e   :  { %v458_v0 = vpop.f32.mrb[23].mxu0  ;;  %v1470_v6 = vpop.f32.mrb[23].mxu1  ;;  %v763_v8 = vmul.f32 %v1058_v62, %v1058_v62 }
 0x10f   :  { %v689_v2 = vadd.f32 %v688_v63, %v458_v0  ;;  %v762_v4 = vmul.f32 %v458_v0, %v458_v0  ;;  %v824_v5 = vadd.f32 %v823_v60, %v761_v59 }
 0x111   :  { %v825_v9 = vadd.f32 %v824_v5, %v762_v4  ;;  %v1061_v10 = vpop.f32.mrb[24].mxu0  ;;  %v690_v12 = vadd.f32 %v1058_v62, %v689_v2  ;;  %v1472_v16 = vpop.f32.mrb[24].mxu1 }
 0x112   :  { %v468_v13 = vpop.f32.mrb[25].mxu0  ;;  %v1474_v23 = vpop.f32.mrb[25].mxu1  ;;  %v765_v24 = vmul.f32 %v1061_v10, %v1061_v10 }
 0x113   :  { %v691_v17 = vadd.f32 %v690_v12, %v468_v13  ;;  %v764_v19 = vmul.f32 %v468_v13, %v468_v13  ;;  %v826_v22 = vadd.f32 %v825_v9, %v763_v8  ;;  %v772_v12 = vmul.f32 %v1426_v14, %v1426_v14 }
 0x115   :  { %v827_v25 = vadd.f32 %v826_v22, %v764_v19  ;;  %v1064_v26 = vpop.f32.mrb[26].mxu0  ;;  %v692_v29 = vadd.f32 %v1061_v10, %v691_v17  ;;  %v1476_v32 = vpop.f32.mrb[26].mxu1  ;;  %v773_v19 = vmul.f32 %v1424_v11, %v1424_v11 }
 0x116   :  { %v478_v30 = vpop.f32.mrb[27].mxu0  ;;  %v1478_v38 = vpop.f32.mrb[27].mxu1  ;;  %v767_v39 = vmul.f32 %v1064_v26, %v1064_v26 }
 0x117   :  { %v693_v34 = vadd.f32 %v692_v29, %v478_v30  ;;  %v766_v35 = vmul.f32 %v478_v30, %v478_v30  ;;  %v828_v36 = vadd.f32 %v827_v25, %v765_v24  ;;  %v774_v25 = vmul.f32 %v1430_v21, %v1430_v21 }
 0x118   :  { %v775_v30 = vmul.f32 %v1428_v18, %v1428_v18 }
 0x119   :  { %v829_v42 = vadd.f32 %v828_v36, %v766_v35  ;;  %v1067_v43 = vpop.f32.mrb[28].mxu0  ;;  %v694_v44 = vadd.f32 %v1064_v26, %v693_v34  ;;  %v1480_v48 = vpop.f32.mrb[28].mxu1 }
 0x11a   :  { %v488_v46 = vpop.f32.mrb[29].mxu0  ;;  %v1482_v54 = vpop.f32.mrb[29].mxu1  ;;  %v769_v55 = vmul.f32 %v1067_v43, %v1067_v43 }
 0x11b   :  { %v695_v49 = vadd.f32 %v694_v44, %v488_v46  ;;  %v768_v50 = vmul.f32 %v488_v46, %v488_v46  ;;  %v830_v52 = vadd.f32 %v829_v42, %v767_v39 }
 0x11d   :  { %v831_v56 = vadd.f32 %v830_v52, %v768_v50  ;;  %v1070_v59 = vpop.f32.mrb[30].mxu0  ;;  %v696_v60 = vadd.f32 %v1067_v43, %v695_v49  ;;  %v1484_v63 = vpop.f32.mrb[30].mxu1 }
 0x11e   :  { %v498_v62 = vpop.f32.mrb[31].mxu0  ;;  %v1486_v5 = vpop.f32.mrb[31].mxu1  ;;  %v771_v8 = vmul.f32 %v1070_v59, %v1070_v59 }
 0x11f   :  { %v697_v0 = vadd.f32 %v696_v60, %v498_v62  ;;  %v770_v2 = vmul.f32 %v498_v62, %v498_v62  ;;  %v832_v4 = vadd.f32 %v831_v56, %v769_v55 }
 0x121   :  { %v698_v9 = vadd.f32 %v1070_v59, %v697_v0  ;;  %v833_v10 = vadd.f32 %v832_v4, %v770_v2 }
 0x123   :  { %v834_v13 = vadd.f32 %v833_v10, %v771_v8  ;;  %v699_v17 = vadd.f32 %v698_v9, %v1426_v14  ;;  %v776_v14 = vmul.f32 %v1434_v31, %v1434_v31 }
 0x125   :  { %v835_v22 = vadd.f32 %v834_v13, %v772_v12  ;;  %v700_v24 = vadd.f32 %v1424_v11, %v699_v17  ;;  %v777_v11 = vmul.f32 %v1432_v27, %v1432_v27 }
 0x127   :  { %v701_v26 = vadd.f32 %v700_v24, %v1430_v21  ;;  %v836_v29 = vadd.f32 %v835_v22, %v773_v19  ;;  %v778_v21 = vmul.f32 %v1438_v41, %v1438_v41 }
 0x129   :  { %v837_v34 = vadd.f32 %v836_v29, %v774_v25  ;;  %v702_v35 = vadd.f32 %v1428_v18, %v701_v26  ;;  %v779_v18 = vmul.f32 %v1436_v37, %v1436_v37 }
 0x12b   :  { %v703_v36 = vadd.f32 %v702_v35, %v1434_v31  ;;  %v838_v39 = vadd.f32 %v837_v34, %v775_v30  ;;  %v780_v31 = vmul.f32 %v1442_v51, %v1442_v51 }
 0x12d   :  { %v839_v42 = vadd.f32 %v838_v39, %v776_v14  ;;  %v704_v43 = vadd.f32 %v1432_v27, %v703_v36  ;;  %v781_v27 = vmul.f32 %v1440_v47, %v1440_v47 }
 0x12f   :  { %v705_v44 = vadd.f32 %v704_v43, %v1438_v41  ;;  %v840_v46 = vadd.f32 %v839_v42, %v777_v11  ;;  %v782_v41 = vmul.f32 %v1446_v61, %v1446_v61 }
 0x131   :  { %v841_v49 = vadd.f32 %v840_v46, %v778_v21  ;;  %v706_v50 = vadd.f32 %v1436_v37, %v705_v44  ;;  %v783_v37 = vmul.f32 %v1444_v57, %v1444_v57 }
 0x133   :  { %v707_v52 = vadd.f32 %v706_v50, %v1442_v51  ;;  %v842_v55 = vadd.f32 %v841_v49, %v779_v18  ;;  %v784_v51 = vmul.f32 %v1450_v7, %v1450_v7 }
 0x135   :  { %v843_v56 = vadd.f32 %v842_v55, %v780_v31  ;;  %v708_v59 = vadd.f32 %v1440_v47, %v707_v52  ;;  %v785_v47 = vmul.f32 %v1448_v3, %v1448_v3 }
 0x137   :  { %v709_v60 = vadd.f32 %v708_v59, %v1446_v61  ;;  %v844_v62 = vadd.f32 %v843_v56, %v781_v27  ;;  %v786_v61 = vmul.f32 %v1454_v20, %v1454_v20 }
 0x139   :  { %v845_v0 = vadd.f32 %v844_v62, %v782_v41  ;;  %v710_v2 = vadd.f32 %v1444_v57, %v709_v60  ;;  %v787_v57 = vmul.f32 %v1452_v15, %v1452_v15 }
 0x13b   :  { %v711_v4 = vadd.f32 %v710_v2, %v1450_v7  ;;  %v846_v8 = vadd.f32 %v845_v0, %v783_v37  ;;  %v788_v7 = vmul.f32 %v1458_v33, %v1458_v33 }
 0x13d   :  { %v847_v9 = vadd.f32 %v846_v8, %v784_v51  ;;  %v712_v10 = vadd.f32 %v1448_v3, %v711_v4  ;;  %v789_v3 = vmul.f32 %v1456_v28, %v1456_v28 }
 0x13f   :  { %v713_v12 = vadd.f32 %v712_v10, %v1454_v20  ;;  %v848_v13 = vadd.f32 %v847_v9, %v785_v47  ;;  %v790_v20 = vmul.f32 %v1462_v45, %v1462_v45 }
 0x141   :  { %v849_v17 = vadd.f32 %v848_v13, %v786_v61  ;;  %v714_v19 = vadd.f32 %v1452_v15, %v713_v12  ;;  %v791_v15 = vmul.f32 %v1460_v40, %v1460_v40 }
 0x143   :  { %v715_v22 = vadd.f32 %v714_v19, %v1458_v33  ;;  %v850_v24 = vadd.f32 %v849_v17, %v787_v57  ;;  %v792_v33 = vmul.f32 %v1466_v58, %v1466_v58 }
 0x145   :  { %v851_v25 = vadd.f32 %v850_v24, %v788_v7  ;;  %v716_v26 = vadd.f32 %v1456_v28, %v715_v22  ;;  %v793_v28 = vmul.f32 %v1464_v53, %v1464_v53 }
 0x147   :  { %v717_v29 = vadd.f32 %v716_v26, %v1462_v45  ;;  %v852_v30 = vadd.f32 %v851_v25, %v789_v3  ;;  %v794_v45 = vmul.f32 %v1470_v6, %v1470_v6 }
 0x149   :  { %v853_v34 = vadd.f32 %v852_v30, %v790_v20  ;;  %v718_v35 = vadd.f32 %v1460_v40, %v717_v29  ;;  %v795_v40 = vmul.f32 %v1468_v1, %v1468_v1 }
 0x14b   :  { %v719_v14 = vadd.f32 %v718_v35, %v1466_v58  ;;  %v854_v36 = vadd.f32 %v853_v34, %v791_v15  ;;  %v796_v58 = vmul.f32 %v1474_v23, %v1474_v23 }
 0x14d   :  { %v855_v39 = vadd.f32 %v854_v36, %v792_v33  ;;  %v720_v11 = vadd.f32 %v1464_v53, %v719_v14  ;;  %v797_v53 = vmul.f32 %v1472_v16, %v1472_v16 }
 0x14f   :  { %v721_v42 = vadd.f32 %v720_v11, %v1470_v6  ;;  %v856_v43 = vadd.f32 %v855_v39, %v793_v28  ;;  %v798_v6 = vmul.f32 %v1478_v38, %v1478_v38 }
 0x151   :  { %v857_v21 = vadd.f32 %v856_v43, %v794_v45  ;;  %v722_v44 = vadd.f32 %v1468_v1, %v721_v42  ;;  %v799_v1 = vmul.f32 %v1476_v32, %v1476_v32 }
 0x153   :  { %v723_v46 = vadd.f32 %v722_v44, %v1474_v23  ;;  %v858_v18 = vadd.f32 %v857_v21, %v795_v40  ;;  %v800_v23 = vmul.f32 %v1482_v54, %v1482_v54 }
 0x155   :  { %v859_v49 = vadd.f32 %v858_v18, %v796_v58  ;;  %v724_v50 = vadd.f32 %v1472_v16, %v723_v46  ;;  %v801_v16 = vmul.f32 %v1480_v48, %v1480_v48 }
 0x157   :  { %v725_v31 = vadd.f32 %v724_v50, %v1478_v38  ;;  %v860_v52 = vadd.f32 %v859_v49, %v797_v53  ;;  %v802_v38 = vmul.f32 %v1486_v5, %v1486_v5 }
 0x159   :  { %v861_v55 = vadd.f32 %v860_v52, %v798_v6  ;;  %v726_v27 = vadd.f32 %v1476_v32, %v725_v31  ;;  %v803_v32 = vmul.f32 %v1484_v63, %v1484_v63 }
 0x15b   :  { %v727_v56 = vadd.f32 %v726_v27, %v1482_v54  ;;  %v862_v59 = vadd.f32 %v861_v55, %v799_v1 }
 0x15d   :  { %v863_v41 = vadd.f32 %v862_v59, %v800_v23  ;;  %v728_v60 = vadd.f32 %v1480_v48, %v727_v56 }
 0x15f   :  { %v729_v62 = vadd.f32 %v728_v60, %v1486_v5  ;;  %v864_v37 = vadd.f32 %v863_v41, %v801_v16  ;;  %v667_v5 = vld [vmem:[%s1598_s2] sm:$0x1] }
 0x161   :  { %v730_v0 = vadd.f32 %v1484_v63, %v729_v62  ;;  %v865_v2 = vadd.f32 %v864_v37, %v802_v38  ;;  %v739_v63 = vld [vmem:[%s1598_s2 + $0x1] sm:$0x1] }
 0x163   :  { %v731_v54 = vrot.slane %v730_v0, 4  ;;  %v866_v51 = vadd.f32 %v865_v2, %v803_v32 }
 0x165   :  { %v732_v4 = vadd.f32 %v731_v54, %v730_v0  ;;  %v867_v8 = vrot.slane %v866_v51, 4 }
 0x167   :  { %v733_v47 = vrot.slane %v732_v4, 2  ;;  %v868_v9 = vadd.f32 %v867_v8, %v866_v51 }
 0x169   :  { %v734_v10 = vadd.f32 %v733_v47, %v732_v4  ;;  %v869_v48 = vrot.slane %v868_v9, 2 }
 0x16b   :  { %v735_v61 = vrot.slane %v734_v10, 1  ;;  %v870_v12 = vadd.f32 %v869_v48, %v868_v9 }
 0x16d   :  { %v736_v13 = vadd.f32 %v735_v61, %v734_v10  ;;  %v871_v57 = vrot.slane %v870_v12, 1 }
 0x16f   :  { %v737_v17 = vadd.f32 %v736_v13, %v667_v5  ;;  %v872_v19 = vadd.f32 %v871_v57, %v870_v12 }
 0x171   :  { %738 = vst [vmem:[%s1598_s2] sm:$0x1] %v737_v17  ;;  %v873_v7 = vadd.f32 %v872_v19, %v739_v63 }
 0x173   :  { %874 = vst [vmem:[%s1598_s2 + $0x1] sm:$0x1] %v873_v7 }

// kernel: block_forward.3
= control target key start
LH: loop header
LB: loop body
LE: loop exit
PB: predicated region body
PF: predicated region fallthrough
CT: control target
= control target key end

     0   :  { %vm86_vm0 = vcmask 293888   ;;  %vm279_vm1 = vcmask 1043456   ;;  %s1838_s1 = inlined_call_operand.vmem [shape: f32[36,128], index: 1, kind: input, shape index: {}]   ;;  %s1839_s0 = inlined_call_operand.vmem [shape: f32[512,36], index: 0, kind: input, shape index: {}]   ;;  %s1840_s2 = inlined_call_operand.vmem [shape: f32[2,128], index: 2, kind: input, shape index: {}]   ;;  %s1841_s3 = inlined_call_operand.vmem [shape: f32[2,128], index: 3, kind: input, shape index: {}]   ;;  %s1842_s4 = inlined_call_operand.vmem [shape: f32[512,128], index: 4, kind: output, shape index: {}]  }
   0x1   :  { %v81_v0 = vld [vmem:[%s1838_s1] sm:$0xff]  ;;  %v82_v1 = vld [vmem:[%s1838_s1 + $0x8] sm:$0xff]  ;;  %v83_v2 = vld [vmem:[%s1838_s1 + $0x10] sm:$0xff] }
   0x2   :  { %v1190_v3 = vpack.c.bf16 %v82_v1, %v81_v0  ;;  %v84_v4 = vld [vmem:[%s1838_s1 + $0x18] sm:$0xff]  ;;  %v17_v5 = vld [vmem:[%s1839_s0] sm:$0xff]  ;;  %v18_v9 = vld [vmem:[%s1839_s0 + $0x8] sm:$0xff] }
   0x3   :  { %v1194_v6 = vpack.c.bf16 %v84_v4, %v83_v2  ;;  %1094 = vmatprep.mubr.msk.f32.mxu0 %vm86_vm0, %v17_v5  ;;  %v49_v7 = vld [vmem:[%s1839_s0 + $0x100] sm:$0xff]  ;;  %v50_v10 = vld [vmem:[%s1839_s0 + $0x108] sm:$0xff]  ;;  %v19_v11 = vld [vmem:[%s1839_s0 + $0x10] sm:$0xff] }
   0x4   :  { %1191 = vmatprep.subr.bf16.mxu0 %v1190_v3  ;;  %1198 = vmatprep.subr.bf16.mxu1 %v1190_v3  ;;  %v85_v8 = vld [vmem:[%s1838_s1 + $0x20] sm:$0xf]  ;;  %v51_v12 = vld [vmem:[%s1839_s0 + $0x110] sm:$0xff]  ;;  %v20_v13 = vld [vmem:[%s1839_s0 + $0x18] sm:$0xff] }
   0x5   :  { %1193 = vmatpush3.bf16.msra.mxu0 %v1190_v3  ;;  %1201 = vmatpush3.bf16.msra.mxu1 %v1190_v3  ;;  %v52_v14 = vld [vmem:[%s1839_s0 + $0x118] sm:$0xff]  ;;  %v21_v15 = vld [vmem:[%s1839_s0 + $0x20] sm:$0xff]  ;;  %v22_v17 = vld [vmem:[%s1839_s0 + $0x28] sm:$0xff] }
   0x6   :  { %1195 = vmatprep.subr.bf16.mxu0 %v1194_v6  ;;  %1199 = vmatprep.subr.bf16.mxu1 %v1194_v6  ;;  %v53_v16 = vld [vmem:[%s1839_s0 + $0x120] sm:$0xff]  ;;  %v54_v18 = vld [vmem:[%s1839_s0 + $0x128] sm:$0xff]  ;;  %v23_v19 = vld [vmem:[%s1839_s0 + $0x30] sm:$0xff] }
   0x7   :  { %1142 = vmatprep.mubr.msk.f32.mxu1 %vm86_vm0, %v49_v7  ;;  %v55_v20 = vld [vmem:[%s1839_s0 + $0x130] sm:$0xff]  ;;  %v24_v21 = vld [vmem:[%s1839_s0 + $0x38] sm:$0xff]  ;;  %v25_v23 = vld [vmem:[%s1839_s0 + $0x40] sm:$0xff] }
   0x8   :  { %v56_v22 = vld [vmem:[%s1839_s0 + $0x138] sm:$0xff]  ;;  %v57_v24 = vld [vmem:[%s1839_s0 + $0x140] sm:$0xff]  ;;  %v26_v25 = vld [vmem:[%s1839_s0 + $0x48] sm:$0xff] }
   0x9   :  { %1197 = vmatpush3.bf16.msra.mxu0 %v1194_v6  ;;  %1202 = vmatpush3.bf16.msra.mxu1 %v1194_v6  ;;  %v58_v26 = vld [vmem:[%s1839_s0 + $0x148] sm:$0xff]  ;;  %v27_v27 = vld [vmem:[%s1839_s0 + $0x50] sm:$0xff]  ;;  %v28_v29 = vld [vmem:[%s1839_s0 + $0x58] sm:$0xff] }
   0xa   :  { %1092 = vmatprep.subr.msk.mxu0 %vm279_vm1, %v85_v8  ;;  %1200 = vmatprep.subr.msk.mxu1 %vm279_vm1, %v85_v8  ;;  %v59_v28 = vld [vmem:[%s1839_s0 + $0x150] sm:$0xff]  ;;  %v60_v30 = vld [vmem:[%s1839_s0 + $0x158] sm:$0xff]  ;;  %v29_v31 = vld [vmem:[%s1839_s0 + $0x60] sm:$0xff] }
   0xb   :  { %v61_v32 = vld [vmem:[%s1839_s0 + $0x160] sm:$0xff]  ;;  %v30_v33 = vld [vmem:[%s1839_s0 + $0x68] sm:$0xff]  ;;  %v31_v35 = vld [vmem:[%s1839_s0 + $0x70] sm:$0xff] }
   0xc   :  { %v62_v34 = vld [vmem:[%s1839_s0 + $0x168] sm:$0xff]  ;;  %v63_v36 = vld [vmem:[%s1839_s0 + $0x170] sm:$0xff]  ;;  %v32_v37 = vld [vmem:[%s1839_s0 + $0x78] sm:$0xff] }
   0xd   :  { %1093 = vmatpush3.msk.msra.mxu0 %vm279_vm1, %v85_v8  ;;  %1203 = vmatpush3.msk.msra.mxu1 %vm279_vm1, %v85_v8  ;;  %v64_v38 = vld [vmem:[%s1839_s0 + $0x178] sm:$0xff]  ;;  %v33_v39 = vld [vmem:[%s1839_s0 + $0x80] sm:$0xff]  ;;  %v34_v41 = vld [vmem:[%s1839_s0 + $0x88] sm:$0xff] }
   0xe   :  { %1095 = vmatmul.mubr.msk.f32.vlgmr.msra.gmra.mrb[0].mxu0 %vm86_vm0, %v18_v9  ;;  %1143 = vmatmul.mubr.msk.f32.vlgmr.msra.gmra.mrb[0].mxu1 %vm86_vm0, %v50_v10  ;;  %v65_v40 = vld [vmem:[%s1839_s0 + $0x180] sm:$0xff]  ;;  %v66_v42 = vld [vmem:[%s1839_s0 + $0x188] sm:$0xff]  ;;  %v35_v43 = vld [vmem:[%s1839_s0 + $0x90] sm:$0xff] }
   0xf   :  { %1097 = vmatprep.mubr.msk.f32.mxu0 %vm86_vm0, %v19_v11  ;;  %1145 = vmatprep.mubr.msk.f32.mxu1 %vm86_vm0, %v51_v12  ;;  %v67_v44 = vld [vmem:[%s1839_s0 + $0x190] sm:$0xff]  ;;  %v36_v45 = vld [vmem:[%s1839_s0 + $0x98] sm:$0xff]  ;;  %v37_v47 = vld [vmem:[%s1839_s0 + $0xa0] sm:$0xff] }
  0x10   :  { %v68_v46 = vld [vmem:[%s1839_s0 + $0x198] sm:$0xff]  ;;  %v69_v48 = vld [vmem:[%s1839_s0 + $0x1a0] sm:$0xff]  ;;  %v38_v49 = vld [vmem:[%s1839_s0 + $0xa8] sm:$0xff] }
  0x11   :  { %v70_v50 = vld [vmem:[%s1839_s0 + $0x1a8] sm:$0xff]  ;;  %v39_v51 = vld [vmem:[%s1839_s0 + $0xb0] sm:$0xff]  ;;  %v40_v53 = vld [vmem:[%s1839_s0 + $0xb8] sm:$0xff] }
  0x12   :  { %1098 = vmatmul.mubr.msk.f32.gmra.mrb[2].mxu0 %vm86_vm0, %v20_v13  ;;  %1146 = vmatmul.mubr.msk.f32.gmra.mrb[2].mxu1 %vm86_vm0, %v52_v14  ;;  %v71_v52 = vld [vmem:[%s1839_s0 + $0x1b0] sm:$0xff]  ;;  %v72_v54 = vld [vmem:[%s1839_s0 + $0x1b8] sm:$0xff]  ;;  %v41_v55 = vld [vmem:[%s1839_s0 + $0xc0] sm:$0xff] }
  0x13   :  { %1100 = vmatprep.mubr.msk.f32.mxu0 %vm86_vm0, %v21_v15  ;;  %1148 = vmatprep.mubr.msk.f32.mxu1 %vm86_vm0, %v53_v16  ;;  %v73_v56 = vld [vmem:[%s1839_s0 + $0x1c0] sm:$0xff]  ;;  %v42_v57 = vld [vmem:[%s1839_s0 + $0xc8] sm:$0xff]  ;;  %v43_v59 = vld [vmem:[%s1839_s0 + $0xd0] sm:$0xff] }
  0x14   :  { %v74_v58 = vld [vmem:[%s1839_s0 + $0x1c8] sm:$0xff]  ;;  %v75_v60 = vld [vmem:[%s1839_s0 + $0x1d0] sm:$0xff]  ;;  %v44_v61 = vld [vmem:[%s1839_s0 + $0xd8] sm:$0xff] }
  0x15   :  { %v76_v62 = vld [vmem:[%s1839_s0 + $0x1d8] sm:$0xff]  ;;  %v45_v63 = vld [vmem:[%s1839_s0 + $0xe0] sm:$0xff]  ;;  %v46_v1 = vld [vmem:[%s1839_s0 + $0xe8] sm:$0xff] }
  0x16   :  { %1101 = vmatmul.mubr.msk.f32.gmra.mrb[4].mxu0 %vm86_vm0, %v22_v17  ;;  %1149 = vmatmul.mubr.msk.f32.gmra.mrb[4].mxu1 %vm86_vm0, %v54_v18  ;;  %v77_v0 = vld [vmem:[%s1839_s0 + $0x1e0] sm:$0xff]  ;;  %v78_v2 = vld [vmem:[%s1839_s0 + $0x1e8] sm:$0xff]  ;;  %v47_v3 = vld [vmem:[%s1839_s0 + $0xf0] sm:$0xff]  ;;  %v682_v17 = vlaneseq }
  0x17   :  { %1103 = vmatprep.mubr.msk.f32.mxu0 %vm86_vm0, %v23_v19  ;;  %1151 = vmatprep.mubr.msk.f32.mxu1 %vm86_vm0, %v55_v20  ;;  %v79_v4 = vld [vmem:[%s1839_s0 + $0x1f0] sm:$0xff]  ;;  %v48_v5 = vld [vmem:[%s1839_s0 + $0xf8] sm:$0xff]  ;;  %v668_v7 = vld [vmem:[%s1840_s2] sm:$0x1] }
  0x18   :  { %v80_v6 = vld [vmem:[%s1839_s0 + $0x1f8] sm:$0xff]  ;;  %v669_v8 = vmul.f32 0.001953125, %v668_v7  ;;  %v670_v9 = vld [vmem:[%s1840_s2 + $0x1] sm:$0x1]  ;;  %v675_v16 = vld [vmem:[%s1841_s3] sm:$0x1] }
  0x19   :  { %v671_v10 = vmul.f32 0.001953125, %v670_v9  ;;  %v683_v19 = vshrl.u32 %v682_v17, 7 }
  0x1a   :  { %1104 = vmatmul.mubr.msk.f32.gmra.mrb[6].mxu0 %vm86_vm0, %v24_v21  ;;  %1152 = vmatmul.mubr.msk.f32.gmra.mrb[6].mxu1 %vm86_vm0, %v56_v22  ;;  %v672_v11 = vmul.f32 %v669_v8, %v669_v8  ;;  %v679_v21 = vld [vmem:[%s1841_s3 + $0x1] sm:$0x1] }
  0x1b   :  { %1106 = vmatprep.mubr.msk.f32.mxu0 %vm86_vm0, %v25_v23  ;;  %1154 = vmatprep.mubr.msk.f32.mxu1 %vm86_vm0, %v57_v24  ;;  %v684_v22 = vsub.s32 0, %v683_v19 }
  0x1c   :  { %v673_v12 = vsub.f32 %v671_v10, %v672_v11 }
  0x1e   :  { %1107 = vmatmul.mubr.msk.f32.gmra.mrb[8].mxu0 %vm86_vm0, %v26_v25  ;;  %1155 = vmatmul.mubr.msk.f32.gmra.mrb[8].mxu1 %vm86_vm0, %v58_v26  ;;  %v674_v13 = vmax.f32 %v673_v12, 0.0 }
  0x1f   :  { %1109 = vmatprep.mubr.msk.f32.mxu0 %vm86_vm0, %v27_v27  ;;  %1157 = vmatprep.mubr.msk.f32.mxu1 %vm86_vm0, %v59_v28 }
  0x20   :  { %v676_v14 = vadd.f32 1e-05, %v674_v13 }
  0x22   :  { %1110 = vmatmul.mubr.msk.f32.gmra.mrb[10].mxu0 %vm86_vm0, %v28_v29  ;;  %1158 = vmatmul.mubr.msk.f32.gmra.mrb[10].mxu1 %vm86_vm0, %v60_v30  ;;  %1204 = vrsqrt.f32 %v676_v14 }
  0x23   :  { %1112 = vmatprep.mubr.msk.f32.mxu0 %vm86_vm0, %v29_v31  ;;  %1160 = vmatprep.mubr.msk.f32.mxu1 %vm86_vm0, %v61_v32 }
  0x26   :  { %1113 = vmatmul.mubr.msk.f32.gmra.mrb[12].mxu0 %vm86_vm0, %v30_v33  ;;  %1161 = vmatmul.mubr.msk.f32.gmra.mrb[12].mxu1 %vm86_vm0, %v62_v34 }
  0x27   :  { %1115 = vmatprep.mubr.msk.f32.mxu0 %vm86_vm0, %v31_v35  ;;  %1163 = vmatprep.mubr.msk.f32.mxu1 %vm86_vm0, %v63_v36 }
  0x2a   :  { %1116 = vmatmul.mubr.msk.f32.gmra.mrb[14].mxu0 %vm86_vm0, %v32_v37  ;;  %1164 = vmatmul.mubr.msk.f32.gmra.mrb[14].mxu1 %vm86_vm0, %v64_v38 }
  0x2b   :  { %1118 = vmatprep.mubr.msk.f32.mxu0 %vm86_vm0, %v33_v39  ;;  %1166 = vmatprep.mubr.msk.f32.mxu1 %vm86_vm0, %v65_v40 }
  0x2c   :  { %v1205_v15 = vpop.eup %1204 }
  0x2d   :  { %v678_v18 = vmul.f32 %v1205_v15, %v675_v16 }
  0x2e   :  { %1119 = vmatmul.mubr.msk.f32.gmra.mrb[16].mxu0 %vm86_vm0, %v34_v41  ;;  %1167 = vmatmul.mubr.msk.f32.gmra.mrb[16].mxu1 %vm86_vm0, %v66_v42 }
  0x2f   :  { %1121 = vmatprep.mubr.msk.f32.mxu0 %vm86_vm0, %v35_v43  ;;  %1169 = vmatprep.mubr.msk.f32.mxu1 %vm86_vm0, %v67_v44  ;;  %v680_v20 = vmul.f32 %v678_v18, %v669_v8  ;;  %v1514_v24 = vrot.slane %v678_v18, %v684_v22 }
  0x31   :  { %v681_v23 = vsub.f32 %v679_v21, %v680_v20 }
  0x32   :  { %1122 = vmatmul.mubr.msk.f32.gmra.mrb[18].mxu0 %vm86_vm0, %v36_v45  ;;  %1170 = vmatmul.mubr.msk.f32.gmra.mrb[18].mxu1 %vm86_vm0, %v68_v46 }
  0x33   :  { %1124 = vmatprep.mubr.msk.f32.mxu0 %vm86_vm0, %v37_v47  ;;  %1172 = vmatprep.mubr.msk.f32.mxu1 %vm86_vm0, %v69_v48  ;;  %v1516_v25 = vrot.slane %v681_v23, %v684_v22 }
  0x36   :  { %1125 = vmatmul.mubr.msk.f32.gmra.mrb[20].mxu0 %vm86_vm0, %v38_v49  ;;  %1173 = vmatmul.mubr.msk.f32.gmra.mrb[20].mxu1 %vm86_vm0, %v70_v50 }
  0x37   :  { %1127 = vmatprep.mubr.msk.f32.mxu0 %vm86_vm0, %v39_v51  ;;  %1175 = vmatprep.mubr.msk.f32.mxu1 %vm86_vm0, %v71_v52 }
  0x3a   :  { %1128 = vmatmul.mubr.msk.f32.gmra.mrb[22].mxu0 %vm86_vm0, %v40_v53  ;;  %1176 = vmatmul.mubr.msk.f32.gmra.mrb[22].mxu1 %vm86_vm0, %v72_v54 }
  0x3b   :  { %1130 = vmatprep.mubr.msk.f32.mxu0 %vm86_vm0, %v41_v55  ;;  %1178 = vmatprep.mubr.msk.f32.mxu1 %vm86_vm0, %v73_v56 }
  0x3e   :  { %1131 = vmatmul.mubr.msk.f32.gmra.mrb[24].mxu0 %vm86_vm0, %v42_v57  ;;  %1179 = vmatmul.mubr.msk.f32.gmra.mrb[24].mxu1 %vm86_vm0, %v74_v58 }
  0x3f   :  { %1133 = vmatprep.mubr.msk.f32.mxu0 %vm86_vm0, %v43_v59  ;;  %1181 = vmatprep.mubr.msk.f32.mxu1 %vm86_vm0, %v75_v60 }
  0x42   :  { %1134 = vmatmul.mubr.msk.f32.gmra.mrb[26].mxu0 %vm86_vm0, %v44_v61  ;;  %1182 = vmatmul.mubr.msk.f32.gmra.mrb[26].mxu1 %vm86_vm0, %v76_v62 }
  0x43   :  { %1136 = vmatprep.mubr.msk.f32.mxu0 %vm86_vm0, %v45_v63  ;;  %1184 = vmatprep.mubr.msk.f32.mxu1 %vm86_vm0, %v77_v0 }
  0x46   :  { %1137 = vmatmul.mubr.msk.f32.gmra.mrb[28].mxu0 %vm86_vm0, %v46_v1  ;;  %1185 = vmatmul.mubr.msk.f32.gmra.mrb[28].mxu1 %vm86_vm0, %v78_v2 }
  0x47   :  { %1139 = vmatprep.mubr.msk.f32.mxu0 %vm86_vm0, %v47_v3  ;;  %1187 = vmatprep.mubr.msk.f32.mxu1 %vm86_vm0, %v79_v4 }
  0x4a   :  { %1140 = vmatmul.mubr.msk.f32.gmra.mrb[30].mxu0 %vm86_vm0, %v48_v5  ;;  %1188 = vmatmul.mubr.msk.f32.gmra.mrb[30].mxu1 %vm86_vm0, %v80_v6 }
  0xe1   :  { %v1096_v26 = vpop.f32.mrb[0].mxu0  ;;  %v1144_v27 = vpop.f32.mrb[0].mxu1 }
  0xe2   :  { %v687_v28 = vmul.f32 %v1096_v26, %v1514_v24  ;;  %v719_v29 = vmul.f32 %v1144_v27, %v1514_v24  ;;  %v349_v30 = vpop.f32.mrb[1].mxu0  ;;  %v509_v31 = vpop.f32.mrb[1].mxu1 }
  0xe3   :  { %v686_v32 = vmul.f32 %v1514_v24, %v349_v30  ;;  %v718_v33 = vmul.f32 %v1514_v24, %v509_v31 }
  0xe4   :  { %v755_v34 = vadd.f32 %v1516_v25, %v687_v28  ;;  %v787_v35 = vadd.f32 %v1516_v25, %v719_v29 }
  0xe5   :  { %v754_v36 = vadd.f32 %v1516_v25, %v686_v32  ;;  %v786_v37 = vadd.f32 %v1516_v25, %v718_v33  ;;  %v1099_v38 = vpop.f32.mrb[2].mxu0  ;;  %v1147_v39 = vpop.f32.mrb[2].mxu1 }
  0xe6   :  { %v819_v40 = vmax.f32 %v755_v34, 0.0  ;;  %v851_v41 = vmax.f32 %v787_v35, 0.0  ;;  %v689_v42 = vmul.f32 %v1099_v38, %v1514_v24  ;;  %v721_v43 = vmul.f32 %v1147_v39, %v1514_v24  ;;  %v359_v44 = vpop.f32.mrb[3].mxu0  ;;  %v519_v45 = vpop.f32.mrb[3].mxu1 }
  0xe7   :  { %v818_v46 = vmax.f32 %v754_v36, 0.0  ;;  %v850_v47 = vmax.f32 %v786_v37, 0.0  ;;  %v688_v48 = vmul.f32 %v1514_v24, %v359_v44  ;;  %v720_v49 = vmul.f32 %v1514_v24, %v519_v45 }
  0xe8   :  { %883 = vst [vmem:[%s1842_s4 + $0x8] sm:$0xff] %v819_v40  ;;  %915 = vst [vmem:[%s1842_s4 + $0x108] sm:$0xff] %v851_v41  ;;  %v757_v50 = vadd.f32 %v1516_v25, %v689_v42  ;;  %v789_v51 = vadd.f32 %v1516_v25, %v721_v43 }
  0xe9   :  { %882 = vst [vmem:[%s1842_s4] sm:$0xff] %v818_v46  ;;  %914 = vst [vmem:[%s1842_s4 + $0x100] sm:$0xff] %v850_v47  ;;  %v756_v52 = vadd.f32 %v1516_v25, %v688_v48  ;;  %v788_v53 = vadd.f32 %v1516_v25, %v720_v49  ;;  %v1102_v54 = vpop.f32.mrb[4].mxu0  ;;  %v1150_v55 = vpop.f32.mrb[4].mxu1 }
  0xea   :  { %v821_v56 = vmax.f32 %v757_v50, 0.0  ;;  %v853_v57 = vmax.f32 %v789_v51, 0.0  ;;  %v691_v58 = vmul.f32 %v1102_v54, %v1514_v24  ;;  %v723_v59 = vmul.f32 %v1150_v55, %v1514_v24  ;;  %v369_v60 = vpop.f32.mrb[5].mxu0  ;;  %v529_v61 = vpop.f32.mrb[5].mxu1 }
  0xeb   :  { %v820_v62 = vmax.f32 %v756_v52, 0.0  ;;  %v852_v63 = vmax.f32 %v788_v53, 0.0  ;;  %v690_v0 = vmul.f32 %v1514_v24, %v369_v60  ;;  %v722_v1 = vmul.f32 %v1514_v24, %v529_v61 }
  0xec   :  { %885 = vst [vmem:[%s1842_s4 + $0x18] sm:$0xff] %v821_v56  ;;  %917 = vst [vmem:[%s1842_s4 + $0x118] sm:$0xff] %v853_v57  ;;  %v759_v2 = vadd.f32 %v1516_v25, %v691_v58  ;;  %v791_v3 = vadd.f32 %v1516_v25, %v723_v59 }
  0xed   :  { %884 = vst [vmem:[%s1842_s4 + $0x10] sm:$0xff] %v820_v62  ;;  %916 = vst [vmem:[%s1842_s4 + $0x110] sm:$0xff] %v852_v63  ;;  %v758_v4 = vadd.f32 %v1516_v25, %v690_v0  ;;  %v790_v5 = vadd.f32 %v1516_v25, %v722_v1  ;;  %v1105_v6 = vpop.f32.mrb[6].mxu0  ;;  %v1153_v7 = vpop.f32.mrb[6].mxu1 }
  0xee   :  { %v823_v8 = vmax.f32 %v759_v2, 0.0  ;;  %v855_v9 = vmax.f32 %v791_v3, 0.0  ;;  %v693_v10 = vmul.f32 %v1105_v6, %v1514_v24  ;;  %v725_v11 = vmul.f32 %v1153_v7, %v1514_v24  ;;  %v379_v12 = vpop.f32.mrb[7].mxu0  ;;  %v539_v13 = vpop.f32.mrb[7].mxu1 }
  0xef   :  { %v822_v14 = vmax.f32 %v758_v4, 0.0  ;;  %v854_v15 = vmax.f32 %v790_v5, 0.0  ;;  %v692_v16 = vmul.f32 %v1514_v24, %v379_v12  ;;  %v724_v17 = vmul.f32 %v1514_v24, %v539_v13 }
  0xf0   :  { %887 = vst [vmem:[%s1842_s4 + $0x28] sm:$0xff] %v823_v8  ;;  %919 = vst [vmem:[%s1842_s4 + $0x128] sm:$0xff] %v855_v9  ;;  %v761_v18 = vadd.f32 %v1516_v25, %v693_v10  ;;  %v793_v19 = vadd.f32 %v1516_v25, %v725_v11 }
  0xf1   :  { %886 = vst [vmem:[%s1842_s4 + $0x20] sm:$0xff] %v822_v14  ;;  %918 = vst [vmem:[%s1842_s4 + $0x120] sm:$0xff] %v854_v15  ;;  %v760_v20 = vadd.f32 %v1516_v25, %v692_v16  ;;  %v792_v21 = vadd.f32 %v1516_v25, %v724_v17  ;;  %v1108_v22 = vpop.f32.mrb[8].mxu0  ;;  %v1156_v23 = vpop.f32.mrb[8].mxu1 }
  0xf2   :  { %v825_v26 = vmax.f32 %v761_v18, 0.0  ;;  %v857_v27 = vmax.f32 %v793_v19, 0.0  ;;  %v695_v28 = vmul.f32 %v1108_v22, %v1514_v24  ;;  %v727_v29 = vmul.f32 %v1156_v23, %v1514_v24  ;;  %v389_v30 = vpop.f32.mrb[9].mxu0  ;;  %v549_v31 = vpop.f32.mrb[9].mxu1 }
  0xf3   :  { %v824_v32 = vmax.f32 %v760_v20, 0.0  ;;  %v856_v33 = vmax.f32 %v792_v21, 0.0  ;;  %v694_v34 = vmul.f32 %v1514_v24, %v389_v30  ;;  %v726_v35 = vmul.f32 %v1514_v24, %v549_v31 }
  0xf4   :  { %889 = vst [vmem:[%s1842_s4 + $0x38] sm:$0xff] %v825_v26  ;;  %921 = vst [vmem:[%s1842_s4 + $0x138] sm:$0xff] %v857_v27  ;;  %v763_v36 = vadd.f32 %v1516_v25, %v695_v28  ;;  %v795_v37 = vadd.f32 %v1516_v25, %v727_v29 }
  0xf5   :  { %888 = vst [vmem:[%s1842_s4 + $0x30] sm:$0xff] %v824_v32  ;;  %920 = vst [vmem:[%s1842_s4 + $0x130] sm:$0xff] %v856_v33  ;;  %v762_v38 = vadd.f32 %v1516_v25, %v694_v34  ;;  %v794_v39 = vadd.f32 %v1516_v25, %v726_v35  ;;  %v1111_v40 = vpop.f32.mrb[10].mxu0  ;;  %v1159_v41 = vpop.f32.mrb[10].mxu1 }
  0xf6   :  { %v827_v42 = vmax.f32 %v763_v36, 0.0  ;;  %v859_v43 = vmax.f32 %v795_v37, 0.0  ;;  %v697_v44 = vmul.f32 %v1111_v40, %v1514_v24  ;;  %v729_v45 = vmul.f32 %v1159_v41, %v1514_v24  ;;  %v399_v46 = vpop.f32.mrb[11].mxu0  ;;  %v559_v47 = vpop.f32.mrb[11].mxu1 }
  0xf7   :  { %v826_v48 = vmax.f32 %v762_v38, 0.0  ;;  %v858_v49 = vmax.f32 %v794_v39, 0.0  ;;  %v696_v50 = vmul.f32 %v1514_v24, %v399_v46  ;;  %v728_v51 = vmul.f32 %v1514_v24, %v559_v47 }
  0xf8   :  { %891 = vst [vmem:[%s1842_s4 + $0x48] sm:$0xff] %v827_v42  ;;  %923 = vst [vmem:[%s1842_s4 + $0x148] sm:$0xff] %v859_v43  ;;  %v765_v52 = vadd.f32 %v1516_v25, %v697_v44  ;;  %v797_v53 = vadd.f32 %v1516_v25, %v729_v45 }
  0xf9   :  { %890 = vst [vmem:[%s1842_s4 + $0x40] sm:$0xff] %v826_v48  ;;  %922 = vst [vmem:[%s1842_s4 + $0x140] sm:$0xff] %v858_v49  ;;  %v764_v54 = vadd.f32 %v1516_v25, %v696_v50  ;;  %v796_v55 = vadd.f32 %v1516_v25, %v728_v51  ;;  %v1114_v56 = vpop.f32.mrb[12].mxu0  ;;  %v1162_v57 = vpop.f32.mrb[12].mxu1 }
  0xfa   :  { %v829_v58 = vmax.f32 %v765_v52, 0.0  ;;  %v861_v59 = vmax.f32 %v797_v53, 0.0  ;;  %v699_v60 = vmul.f32 %v1114_v56, %v1514_v24  ;;  %v731_v61 = vmul.f32 %v1162_v57, %v1514_v24  ;;  %v409_v62 = vpop.f32.mrb[13].mxu0  ;;  %v569_v63 = vpop.f32.mrb[13].mxu1 }
  0xfb   :  { %v828_v0 = vmax.f32 %v764_v54, 0.0  ;;  %v860_v1 = vmax.f32 %v796_v55, 0.0  ;;  %v698_v2 = vmul.f32 %v1514_v24, %v409_v62  ;;  %v730_v3 = vmul.f32 %v1514_v24, %v569_v63 }
  0xfc   :  { %893 = vst [vmem:[%s1842_s4 + $0x58] sm:$0xff] %v829_v58  ;;  %925 = vst [vmem:[%s1842_s4 + $0x158] sm:$0xff] %v861_v59  ;;  %v767_v4 = vadd.f32 %v1516_v25, %v699_v60  ;;  %v799_v5 = vadd.f32 %v1516_v25, %v731_v61 }
  0xfd   :  { %892 = vst [vmem:[%s1842_s4 + $0x50] sm:$0xff] %v828_v0  ;;  %924 = vst [vmem:[%s1842_s4 + $0x150] sm:$0xff] %v860_v1  ;;  %v766_v6 = vadd.f32 %v1516_v25, %v698_v2  ;;  %v798_v7 = vadd.f32 %v1516_v25, %v730_v3  ;;  %v1117_v8 = vpop.f32.mrb[14].mxu0  ;;  %v1165_v9 = vpop.f32.mrb[14].mxu1 }
  0xfe   :  { %v831_v10 = vmax.f32 %v767_v4, 0.0  ;;  %v863_v11 = vmax.f32 %v799_v5, 0.0  ;;  %v701_v12 = vmul.f32 %v1117_v8, %v1514_v24  ;;  %v733_v13 = vmul.f32 %v1165_v9, %v1514_v24  ;;  %v419_v14 = vpop.f32.mrb[15].mxu0  ;;  %v579_v15 = vpop.f32.mrb[15].mxu1 }
  0xff   :  { %v830_v16 = vmax.f32 %v766_v6, 0.0  ;;  %v862_v17 = vmax.f32 %v798_v7, 0.0  ;;  %v700_v18 = vmul.f32 %v1514_v24, %v419_v14  ;;  %v732_v19 = vmul.f32 %v1514_v24, %v579_v15 }
 0x100   :  { %895 = vst [vmem:[%s1842_s4 + $0x68] sm:$0xff] %v831_v10  ;;  %927 = vst [vmem:[%s1842_s4 + $0x168] sm:$0xff] %v863_v11  ;;  %v769_v20 = vadd.f32 %v1516_v25, %v701_v12  ;;  %v801_v21 = vadd.f32 %v1516_v25, %v733_v13 }
 0x101   :  { %894 = vst [vmem:[%s1842_s4 + $0x60] sm:$0xff] %v830_v16  ;;  %926 = vst [vmem:[%s1842_s4 + $0x160] sm:$0xff] %v862_v17  ;;  %v768_v22 = vadd.f32 %v1516_v25, %v700_v18  ;;  %v800_v23 = vadd.f32 %v1516_v25, %v732_v19  ;;  %v1120_v26 = vpop.f32.mrb[16].mxu0  ;;  %v1168_v27 = vpop.f32.mrb[16].mxu1 }
 0x102   :  { %v833_v28 = vmax.f32 %v769_v20, 0.0  ;;  %v865_v29 = vmax.f32 %v801_v21, 0.0  ;;  %v703_v30 = vmul.f32 %v1120_v26, %v1514_v24  ;;  %v735_v31 = vmul.f32 %v1168_v27, %v1514_v24  ;;  %v429_v32 = vpop.f32.mrb[17].mxu0  ;;  %v589_v33 = vpop.f32.mrb[17].mxu1 }
 0x103   :  { %v832_v34 = vmax.f32 %v768_v22, 0.0  ;;  %v864_v35 = vmax.f32 %v800_v23, 0.0  ;;  %v702_v36 = vmul.f32 %v1514_v24, %v429_v32  ;;  %v734_v37 = vmul.f32 %v1514_v24, %v589_v33 }
 0x104   :  { %897 = vst [vmem:[%s1842_s4 + $0x78] sm:$0xff] %v833_v28  ;;  %929 = vst [vmem:[%s1842_s4 + $0x178] sm:$0xff] %v865_v29  ;;  %v771_v38 = vadd.f32 %v1516_v25, %v703_v30  ;;  %v803_v39 = vadd.f32 %v1516_v25, %v735_v31 }
 0x105   :  { %896 = vst [vmem:[%s1842_s4 + $0x70] sm:$0xff] %v832_v34  ;;  %928 = vst [vmem:[%s1842_s4 + $0x170] sm:$0xff] %v864_v35  ;;  %v770_v40 = vadd.f32 %v1516_v25, %v702_v36  ;;  %v802_v41 = vadd.f32 %v1516_v25, %v734_v37  ;;  %v1123_v42 = vpop.f32.mrb[18].mxu0  ;;  %v1171_v43 = vpop.f32.mrb[18].mxu1 }
 0x106   :  { %v835_v44 = vmax.f32 %v771_v38, 0.0  ;;  %v867_v45 = vmax.f32 %v803_v39, 0.0  ;;  %v705_v46 = vmul.f32 %v1123_v42, %v1514_v24  ;;  %v737_v47 = vmul.f32 %v1171_v43, %v1514_v24  ;;  %v439_v48 = vpop.f32.mrb[19].mxu0  ;;  %v599_v49 = vpop.f32.mrb[19].mxu1 }
 0x107   :  { %v834_v50 = vmax.f32 %v770_v40, 0.0  ;;  %v866_v51 = vmax.f32 %v802_v41, 0.0  ;;  %v704_v52 = vmul.f32 %v1514_v24, %v439_v48  ;;  %v736_v53 = vmul.f32 %v1514_v24, %v599_v49 }
 0x108   :  { %899 = vst [vmem:[%s1842_s4 + $0x88] sm:$0xff] %v835_v44  ;;  %931 = vst [vmem:[%s1842_s4 + $0x188] sm:$0xff] %v867_v45  ;;  %v773_v54 = vadd.f32 %v1516_v25, %v705_v46  ;;  %v805_v55 = vadd.f32 %v1516_v25, %v737_v47 }
 0x109   :  { %898 = vst [vmem:[%s1842_s4 + $0x80] sm:$0xff] %v834_v50  ;;  %930 = vst [vmem:[%s1842_s4 + $0x180] sm:$0xff] %v866_v51  ;;  %v772_v56 = vadd.f32 %v1516_v25, %v704_v52  ;;  %v804_v57 = vadd.f32 %v1516_v25, %v736_v53  ;;  %v1126_v58 = vpop.f32.mrb[20].mxu0  ;;  %v1174_v59 = vpop.f32.mrb[20].mxu1 }
 0x10a   :  { %v837_v60 = vmax.f32 %v773_v54, 0.0  ;;  %v869_v61 = vmax.f32 %v805_v55, 0.0  ;;  %v707_v62 = vmul.f32 %v1126_v58, %v1514_v24  ;;  %v739_v63 = vmul.f32 %v1174_v59, %v1514_v24  ;;  %v449_v0 = vpop.f32.mrb[21].mxu0  ;;  %v609_v1 = vpop.f32.mrb[21].mxu1 }
 0x10b   :  { %v836_v2 = vmax.f32 %v772_v56, 0.0  ;;  %v868_v3 = vmax.f32 %v804_v57, 0.0  ;;  %v706_v4 = vmul.f32 %v1514_v24, %v449_v0  ;;  %v738_v5 = vmul.f32 %v1514_v24, %v609_v1 }
 0x10c   :  { %901 = vst [vmem:[%s1842_s4 + $0x98] sm:$0xff] %v837_v60  ;;  %933 = vst [vmem:[%s1842_s4 + $0x198] sm:$0xff] %v869_v61  ;;  %v775_v6 = vadd.f32 %v1516_v25, %v707_v62  ;;  %v807_v7 = vadd.f32 %v1516_v25, %v739_v63 }
 0x10d   :  { %900 = vst [vmem:[%s1842_s4 + $0x90] sm:$0xff] %v836_v2  ;;  %932 = vst [vmem:[%s1842_s4 + $0x190] sm:$0xff] %v868_v3  ;;  %v774_v8 = vadd.f32 %v1516_v25, %v706_v4  ;;  %v806_v9 = vadd.f32 %v1516_v25, %v738_v5  ;;  %v1129_v10 = vpop.f32.mrb[22].mxu0  ;;  %v1177_v11 = vpop.f32.mrb[22].mxu1 }
 0x10e   :  { %v839_v12 = vmax.f32 %v775_v6, 0.0  ;;  %v871_v13 = vmax.f32 %v807_v7, 0.0  ;;  %v709_v14 = vmul.f32 %v1129_v10, %v1514_v24  ;;  %v741_v15 = vmul.f32 %v1177_v11, %v1514_v24  ;;  %v459_v16 = vpop.f32.mrb[23].mxu0  ;;  %v619_v17 = vpop.f32.mrb[23].mxu1 }
 0x10f   :  { %v838_v18 = vmax.f32 %v774_v8, 0.0  ;;  %v870_v19 = vmax.f32 %v806_v9, 0.0  ;;  %v708_v20 = vmul.f32 %v1514_v24, %v459_v16  ;;  %v740_v21 = vmul.f32 %v1514_v24, %v619_v17 }
 0x110   :  { %903 = vst [vmem:[%s1842_s4 + $0xa8] sm:$0xff] %v839_v12  ;;  %935 = vst [vmem:[%s1842_s4 + $0x1a8] sm:$0xff] %v871_v13  ;;  %v777_v22 = vadd.f32 %v1516_v25, %v709_v14  ;;  %v809_v23 = vadd.f32 %v1516_v25, %v741_v15 }
 0x111   :  { %902 = vst [vmem:[%s1842_s4 + $0xa0] sm:$0xff] %v838_v18  ;;  %934 = vst [vmem:[%s1842_s4 + $0x1a0] sm:$0xff] %v870_v19  ;;  %v776_v26 = vadd.f32 %v1516_v25, %v708_v20  ;;  %v808_v27 = vadd.f32 %v1516_v25, %v740_v21  ;;  %v1132_v28 = vpop.f32.mrb[24].mxu0  ;;  %v1180_v29 = vpop.f32.mrb[24].mxu1 }
 0x112   :  { %v841_v30 = vmax.f32 %v777_v22, 0.0  ;;  %v873_v31 = vmax.f32 %v809_v23, 0.0  ;;  %v711_v32 = vmul.f32 %v1132_v28, %v1514_v24  ;;  %v743_v33 = vmul.f32 %v1180_v29, %v1514_v24  ;;  %v469_v34 = vpop.f32.mrb[25].mxu0  ;;  %v629_v35 = vpop.f32.mrb[25].mxu1 }
 0x113   :  { %v840_v36 = vmax.f32 %v776_v26, 0.0  ;;  %v872_v37 = vmax.f32 %v808_v27, 0.0  ;;  %v710_v38 = vmul.f32 %v1514_v24, %v469_v34  ;;  %v742_v39 = vmul.f32 %v1514_v24, %v629_v35 }
 0x114   :  { %905 = vst [vmem:[%s1842_s4 + $0xb8] sm:$0xff] %v841_v30  ;;  %937 = vst [vmem:[%s1842_s4 + $0x1b8] sm:$0xff] %v873_v31  ;;  %v779_v40 = vadd.f32 %v1516_v25, %v711_v32  ;;  %v811_v41 = vadd.f32 %v1516_v25, %v743_v33 }
 0x115   :  { %904 = vst [vmem:[%s1842_s4 + $0xb0] sm:$0xff] %v840_v36  ;;  %936 = vst [vmem:[%s1842_s4 + $0x1b0] sm:$0xff] %v872_v37  ;;  %v778_v42 = vadd.f32 %v1516_v25, %v710_v38  ;;  %v810_v43 = vadd.f32 %v1516_v25, %v742_v39  ;;  %v1135_v44 = vpop.f32.mrb[26].mxu0  ;;  %v1183_v45 = vpop.f32.mrb[26].mxu1 }
 0x116   :  { %v843_v46 = vmax.f32 %v779_v40, 0.0  ;;  %v875_v47 = vmax.f32 %v811_v41, 0.0  ;;  %v713_v48 = vmul.f32 %v1135_v44, %v1514_v24  ;;  %v745_v49 = vmul.f32 %v1183_v45, %v1514_v24  ;;  %v479_v50 = vpop.f32.mrb[27].mxu0  ;;  %v639_v51 = vpop.f32.mrb[27].mxu1 }
 0x117   :  { %v842_v52 = vmax.f32 %v778_v42, 0.0  ;;  %v874_v53 = vmax.f32 %v810_v43, 0.0  ;;  %v712_v54 = vmul.f32 %v1514_v24, %v479_v50  ;;  %v744_v55 = vmul.f32 %v1514_v24, %v639_v51 }
 0x118   :  { %907 = vst [vmem:[%s1842_s4 + $0xc8] sm:$0xff] %v843_v46  ;;  %939 = vst [vmem:[%s1842_s4 + $0x1c8] sm:$0xff] %v875_v47  ;;  %v781_v56 = vadd.f32 %v1516_v25, %v713_v48  ;;  %v813_v57 = vadd.f32 %v1516_v25, %v745_v49 }
 0x119   :  { %906 = vst [vmem:[%s1842_s4 + $0xc0] sm:$0xff] %v842_v52  ;;  %938 = vst [vmem:[%s1842_s4 + $0x1c0] sm:$0xff] %v874_v53  ;;  %v780_v58 = vadd.f32 %v1516_v25, %v712_v54  ;;  %v812_v59 = vadd.f32 %v1516_v25, %v744_v55  ;;  %v1138_v60 = vpop.f32.mrb[28].mxu0  ;;  %v1186_v61 = vpop.f32.mrb[28].mxu1 }
 0x11a   :  { %v845_v62 = vmax.f32 %v781_v56, 0.0  ;;  %v877_v63 = vmax.f32 %v813_v57, 0.0  ;;  %v715_v0 = vmul.f32 %v1138_v60, %v1514_v24  ;;  %v747_v1 = vmul.f32 %v1186_v61, %v1514_v24  ;;  %v489_v2 = vpop.f32.mrb[29].mxu0  ;;  %v649_v3 = vpop.f32.mrb[29].mxu1 }
 0x11b   :  { %v844_v4 = vmax.f32 %v780_v58, 0.0  ;;  %v876_v5 = vmax.f32 %v812_v59, 0.0  ;;  %v714_v6 = vmul.f32 %v1514_v24, %v489_v2  ;;  %v746_v7 = vmul.f32 %v1514_v24, %v649_v3 }
 0x11c   :  { %909 = vst [vmem:[%s1842_s4 + $0xd8] sm:$0xff] %v845_v62  ;;  %941 = vst [vmem:[%s1842_s4 + $0x1d8] sm:$0xff] %v877_v63  ;;  %v783_v8 = vadd.f32 %v1516_v25, %v715_v0  ;;  %v815_v9 = vadd.f32 %v1516_v25, %v747_v1 }
 0x11d   :  { %908 = vst [vmem:[%s1842_s4 + $0xd0] sm:$0xff] %v844_v4  ;;  %940 = vst [vmem:[%s1842_s4 + $0x1d0] sm:$0xff] %v876_v5  ;;  %v782_v10 = vadd.f32 %v1516_v25, %v714_v6  ;;  %v814_v11 = vadd.f32 %v1516_v25, %v746_v7  ;;  %v1141_v12 = vpop.f32.mrb[30].mxu0  ;;  %v1189_v13 = vpop.f32.mrb[30].mxu1 }
 0x11e   :  { %v847_v14 = vmax.f32 %v783_v8, 0.0  ;;  %v879_v15 = vmax.f32 %v815_v9, 0.0  ;;  %v717_v16 = vmul.f32 %v1141_v12, %v1514_v24  ;;  %v749_v17 = vmul.f32 %v1189_v13, %v1514_v24  ;;  %v499_v18 = vpop.f32.mrb[31].mxu0  ;;  %v659_v19 = vpop.f32.mrb[31].mxu1 }
 0x11f   :  { %v846_v20 = vmax.f32 %v782_v10, 0.0  ;;  %v878_v21 = vmax.f32 %v814_v11, 0.0  ;;  %v716_v22 = vmul.f32 %v1514_v24, %v499_v18  ;;  %v748_v23 = vmul.f32 %v1514_v24, %v659_v19 }
 0x120   :  { %911 = vst [vmem:[%s1842_s4 + $0xe8] sm:$0xff] %v847_v14  ;;  %943 = vst [vmem:[%s1842_s4 + $0x1e8] sm:$0xff] %v879_v15  ;;  %v785_v26 = vadd.f32 %v1516_v25, %v717_v16  ;;  %v817_v27 = vadd.f32 %v1516_v25, %v749_v17 }
 0x121   :  { %910 = vst [vmem:[%s1842_s4 + $0xe0] sm:$0xff] %v846_v20  ;;  %942 = vst [vmem:[%s1842_s4 + $0x1e0] sm:$0xff] %v878_v21  ;;  %v784_v24 = vadd.f32 %v1516_v25, %v716_v22  ;;  %v816_v28 = vadd.f32 %v1516_v25, %v748_v23 }
 0x122   :  { %v849_v29 = vmax.f32 %v785_v26, 0.0  ;;  %v881_v30 = vmax.f32 %v817_v27, 0.0 }
 0x123   :  { %v848_v31 = vmax.f32 %v784_v24, 0.0  ;;  %v880_v32 = vmax.f32 %v816_v28, 0.0 }
 0x124   :  { %913 = vst [vmem:[%s1842_s4 + $0xf8] sm:$0xff] %v849_v29  ;;  %945 = vst [vmem:[%s1842_s4 + $0x1f8] sm:$0xff] %v881_v30 }
 0x125   :  { %912 = vst [vmem:[%s1842_s4 + $0xf0] sm:$0xff] %v848_v31  ;;  %944 = vst [vmem:[%s1842_s4 + $0x1f0] sm:$0xff] %v880_v32 }

</bundles_post_ra>
